<compile_context>
chip_gen: v7x
topology: tpu7x:2x2x1
jax: 0.10.0
libtpu: 0.0.40
codegen_flags: <defaults>
</compile_context>

<pallas_src>
import math
import functools

import jax
import jax.numpy as jnp
from jax import lax
from jax.experimental import pallas as pl
from jax.experimental.pallas import tpu as pltpu


def _round_up(x, m):
    return (x + m - 1) // m * m


def _lstm_layer_kernel(gx_ref, h0_ref, c0_ref, whh_ref,
                       out_ref, hn_ref, cn_ref,
                       h_scr, c_scr,
                       *, hidden_padded, chunk, seq_len, seq_len_padded):
    """One LSTM layer, time-chunked.

    Grid = (T_padded // chunk,), iterated sequentially ("arbitrary"); h/c carried
    across grid steps in f32 VMEM scratch. gx_ref holds the precomputed input
    projection + bias for this time chunk.
    """
    Hp = hidden_padded
    chunk_idx = pl.program_id(0)

    @pl.when(chunk_idx == 0)
    def _():
        h_scr[...] = h0_ref[...].astype(jnp.float32)
        c_scr[...] = c0_ref[...].astype(jnp.float32)

    # Recurrent weight, resident in VMEM for the whole chunk.
    w_hh = whh_ref[...]                      # (Hp, 4*Hp)

    def step(s, carry):
        h_prev = h_scr[...]                  # (B, Hp) f32
        c_prev = c_scr[...]                  # (B, Hp) f32

        # gates = gates_x[t] + h_prev @ W_hh^T   -> (B, 4*Hp), f32 accumulate
        gates = gx_ref[s] + jnp.dot(h_prev.astype(w_hh.dtype), w_hh,
                                    preferred_element_type=jnp.float32)

        i_g = jax.nn.sigmoid(gates[:, 0 * Hp:1 * Hp])
        f_g = jax.nn.sigmoid(gates[:, 1 * Hp:2 * Hp])
        g_g = jnp.tanh(gates[:, 2 * Hp:3 * Hp])
        o_g = jax.nn.sigmoid(gates[:, 3 * Hp:4 * Hp])

        c_new = f_g * c_prev + i_g * g_g
        h_new = o_g * jnp.tanh(c_new)

        if seq_len_padded == seq_len:
            # No time padding: unconditional carry update (zero masking overhead).
            h_scr[...] = h_new
            c_scr[...] = c_new
        else:
            # Freeze the carry on padded timesteps so h_n/c_n stay correct.
            t_global = chunk_idx * chunk + s
            m = (t_global < seq_len).astype(jnp.float32)
            h_scr[...] = m * h_new + (1.0 - m) * h_prev
            c_scr[...] = m * c_new + (1.0 - m) * c_prev

        out_ref[s] = h_new.astype(out_ref.dtype)
        return carry

    lax.fori_loop(0, chunk, step, 0, unroll=True)

    # Final states: write once, on the last grid step only.
    @pl.when(chunk_idx == pl.num_programs(0) - 1)
    def _():
        hn_ref[...] = h_scr[...].astype(hn_ref.dtype)
        cn_ref[...] = c_scr[...].astype(cn_ref.dtype)


def lstm_layer(x, h0, c0, w_ih, w_hh, b_ih, b_hh, *,
               time_chunk=16, matmul_dtype=jnp.float32):
    """x: (T, B, in) with B already a multiple of 8; h0/c0: (B, H);
    w_ih: (4H, in), w_hh: (4H, H), b_*: (4H,)."""
    T, B, I = x.shape
    H = h0.shape[-1]
    Hp = _round_up(H, 128)          # lane-dense hidden (per-gate padding)
    Gp = 4 * Hp
    out_dtype = x.dtype

    # ---- Hoisted input projection: one big (T*B, I) @ (I, 4H) matmul + bias ----
    bias = (b_ih + b_hh).astype(jnp.float32)
    gx = jnp.dot(x.reshape(T * B, I).astype(matmul_dtype),
                 jnp.asarray(w_ih).T.astype(matmul_dtype),
                 preferred_element_type=jnp.float32) + bias          # (T*B, 4H)
    # Pad each gate block's hidden dim H -> Hp (lane-dense layout for the kernel).
    gx = gx.reshape(T, B, 4, H)
    gx = jnp.pad(gx, ((0, 0), (0, 0), (0, 0), (0, Hp - H))).reshape(T, B, Gp)

    # ---- Recurrent weight, per-gate padded and transposed to (Hp, 4*Hp) ----
    whh = jnp.asarray(w_hh).reshape(4, H, H)
    whh = jnp.pad(whh, ((0, 0), (0, Hp - H), (0, Hp - H)))
    whh_t = whh.reshape(Gp, Hp).T.astype(matmul_dtype)               # (Hp, Gp)

    h0p = jnp.pad(h0, ((0, 0), (0, Hp - H))).astype(jnp.float32)     # (B, Hp)
    c0p = jnp.pad(c0, ((0, 0), (0, Hp - H))).astype(jnp.float32)

    # ---- Time chunking ----
    TC = max(1, min(time_chunk, T))
    Tp = _round_up(T, TC)
    if Tp != T:
        gx = jnp.pad(gx, ((0, Tp - T), (0, 0), (0, 0)))
    n_chunks = Tp // TC

    kernel = functools.partial(
        _lstm_layer_kernel,
        hidden_padded=Hp, chunk=TC, seq_len=T, seq_len_padded=Tp)

    out_shapes = (
        jax.ShapeDtypeStruct((Tp, B, Hp), out_dtype),   # per-step hidden output
        jax.ShapeDtypeStruct((B, Hp), out_dtype),       # h_n
        jax.ShapeDtypeStruct((B, Hp), out_dtype),       # c_n
    )

    grid_spec = pltpu.PrefetchScalarGridSpec(
        num_scalar_prefetch=0,
        grid=(n_chunks,),
        in_specs=[
            pl.BlockSpec((TC, B, Gp), lambda t: (t, 0, 0)),   # gates_x chunk
            pl.BlockSpec((B, Hp), lambda t: (0, 0)),          # h0 (resident)
            pl.BlockSpec((B, Hp), lambda t: (0, 0)),          # c0 (resident)
            pl.BlockSpec((Hp, Gp), lambda t: (0, 0)),         # W_hh^T (resident)
        ],
        out_specs=[
            pl.BlockSpec((TC, B, Hp), lambda t: (t, 0, 0)),   # output chunk
            pl.BlockSpec((B, Hp), lambda t: (0, 0)),          # h_n (resident)
            pl.BlockSpec((B, Hp), lambda t: (0, 0)),          # c_n (resident)
        ],
        scratch_shapes=[
            pltpu.VMEM((B, Hp), jnp.float32),                 # h carry
            pltpu.VMEM((B, Hp), jnp.float32),                 # c carry
        ],
    )

    out, h_n, c_n = pl.pallas_call(
        kernel,
        out_shape=out_shapes,
        grid_spec=grid_spec,
        compiler_params=pltpu.CompilerParams(
            dimension_semantics=("arbitrary",),   # time recurrence is sequential
        ),
    )(gx, h0p, c0p, whh_t)

    # Strip time / hidden padding (batch padding is stripped by the caller).
    return out[:T, :, :H], h_n[:, :H], c_n[:, :H]


def rnn_base_lstm_forward(x, hx, all_weights, *,
                          time_chunk=16, matmul_dtype=jnp.float32):
    """RNNBase.forward for mode='LSTM', unidirectional, dropout=0.

    x: (T, B, input_size); hx = (h0, c0) each (num_layers, B, H).
    Returns (output (T, B, H), (h_n, c_n) each (num_layers, B, H)).
    """
    h0, c0 = hx
    num_layers = h0.shape[0]
    T, B, _ = x.shape

    # Pad batch once to a multiple of 8 sublanes; intermediate layer activations
    # stay padded so we only pay the pad/slice at the boundaries.
    Bp = _round_up(B, 8)
    if Bp != B:
        x = jnp.pad(x, ((0, 0), (0, Bp - B), (0, 0)))
        h0 = jnp.pad(h0, ((0, 0), (0, Bp - B), (0, 0)))
        c0 = jnp.pad(c0, ((0, 0), (0, Bp - B), (0, 0)))

    layer_in = x
    h_ns, c_ns = [], []
    for layer in range(num_layers):
        w_ih, w_hh, b_ih, b_hh = all_weights[layer]
        out, h_n, c_n = lstm_layer(layer_in, h0[layer], c0[layer],
                                   w_ih, w_hh, b_ih, b_hh,
                                   time_chunk=time_chunk,
                                   matmul_dtype=matmul_dtype)
        h_ns.append(h_n)
        c_ns.append(c_n)
        layer_in = out

    output = layer_in[:, :B, :]
    h_n = jnp.stack(h_ns, axis=0)[:, :B, :]
    c_n = jnp.stack(c_ns, axis=0)[:, :B, :]
    return output, (h_n, c_n)


# ---------------------------- reference (pure JAX) ----------------------------

def _ref_lstm_layer(x, h0, c0, w_ih, w_hh, b_ih, b_hh):
    H = h0.shape[-1]

    def step(carry, x_t):
        h, c = carry
        gates = x_t @ w_ih.T + h @ w_hh.T + b_ih + b_hh
        i = jax.nn.sigmoid(gates[:, 0 * H:1 * H])
        f = jax.nn.sigmoid(gates[:, 1 * H:2 * H])
        g = jnp.tanh(gates[:, 2 * H:3 * H])
        o = jax.nn.sigmoid(gates[:, 3 * H:4 * H])
        c_new = f * c + i * g
        h_new = o * jnp.tanh(c_new)
        return (h_new, c_new), h_new

    (h_n, c_n), outs = lax.scan(step, (h0, c0), x)
    return outs, h_n, c_n


def _ref_forward(x, hx, all_weights):
    h0, c0 = hx
    layer_in = x
    h_ns, c_ns = [], []
    for layer in range(h0.shape[0]):
        w_ih, w_hh, b_ih, b_hh = all_weights[layer]
        out, h_n, c_n = _ref_lstm_layer(layer_in, h0[layer], c0[layer],
                                        w_ih, w_hh, b_ih, b_hh)
        h_ns.append(h_n)
        c_ns.append(c_n)
        layer_in = out
    return layer_in, (jnp.stack(h_ns), jnp.stack(c_ns))


# --------------------------------- main ---------------------------------------

if __name__ == "__main__":
    # RNNBase(mode='LSTM', input_size=16, hidden_size=32, num_layers=2,
    #         bias=True, batch_first=False, dropout=0, bidirectional=False)
    input_size = 16
    hidden_size = 32
    num_layers = 2
    seq_len = 10      # deliberately not a multiple of the time chunk (tests masking)
    batch = 4         # deliberately not a multiple of 8 (tests batch padding)

    stdv = 1.0 / math.sqrt(hidden_size)
    key = jax.random.PRNGKey(0)

    # Deterministic parameter init matching reset_parameters(): U(-stdv, stdv).
    all_weights = []
    for layer in range(num_layers):
        layer_input_size = input_size if layer == 0 else hidden_size
        gate_size = 4 * hidden_size
        key, k1, k2, k3, k4 = jax.random.split(key, 5)
        w_ih = jax.random.uniform(k1, (gate_size, layer_input_size),
                                  jnp.float32, -stdv, stdv)
        w_hh = jax.random.uniform(k2, (gate_size, hidden_size),
                                  jnp.float32, -stdv, stdv)
        b_ih = jax.random.uniform(k3, (gate_size,), jnp.float32, -stdv, stdv)
        b_hh = jax.random.uniform(k4, (gate_size,), jnp.float32, -stdv, stdv)
        all_weights.append((w_ih, w_hh, b_ih, b_hh))

    key, kx, kh, kc = jax.random.split(key, 4)
    x = jax.random.normal(kx, (seq_len, batch, input_size), jnp.float32)
    h0 = jax.random.normal(kh, (num_layers, batch, hidden_size), jnp.float32)
    c0 = jax.random.normal(kc, (num_layers, batch, hidden_size), jnp.float32)

    # time_chunk=4 -> multi-chunk grid with time padding, exercising carry + mask.
    output, (h_n, c_n) = rnn_base_lstm_forward(x, (h0, c0), all_weights,
                                               time_chunk=4,
                                               matmul_dtype=jnp.float32)
    jax.block_until_ready((output, h_n, c_n))

    ref_out, (ref_h, ref_c) = _ref_forward(x, (h0, c0), all_weights)
    assert output.shape == (seq_len, batch, hidden_size)
    assert h_n.shape == (num_layers, batch, hidden_size)
    assert c_n.shape == (num_layers, batch, hidden_size)
    assert jnp.allclose(output, ref_out, atol=1e-5, rtol=1e-5)
    assert jnp.allclose(h_n, ref_h, atol=1e-5, rtol=1e-5)
    assert jnp.allclose(c_n, ref_c, atol=1e-5, rtol=1e-5)

    print("KERNEL_OK")
</pallas_src>

<mosaic_0001>
module attributes {stable_mosaic.version = 11 : i64} {
  func.func @_lstm_layer_kernel(%arg0: i32, %arg1: memref<4x8x512xf32, #tpu.memory_space<vmem>>, %arg2: memref<8x128xf32, #tpu.memory_space<vmem>>, %arg3: memref<8x128xf32, #tpu.memory_space<vmem>>, %arg4: memref<128x512xf32, #tpu.memory_space<vmem>>, %arg5: memref<4x8x128xf32, #tpu.memory_space<vmem>>, %arg6: memref<8x128xf32, #tpu.memory_space<vmem>>, %arg7: memref<8x128xf32, #tpu.memory_space<vmem>>, %arg8: memref<8x128xf32, #tpu.memory_space<vmem>>, %arg9: memref<8x128xf32, #tpu.memory_space<vmem>>) attributes {dimension_semantics = [#tpu.dimension_semantics<arbitrary>], iteration_bounds = array<i64: 3>, scalar_prefetch = 0 : i64, scratch_operands = 2 : i64, tpu.core_type = #tpu.core_type<tc>, window_params = [{transform_indices = @transform_0, window_bounds = array<i64: 4, 8, 512>}, {pipeline_mode = #tpu.pipeline_mode<synchronous>, transform_indices = @transform_1, window_bounds = array<i64: 8, 128>}, {pipeline_mode = #tpu.pipeline_mode<synchronous>, transform_indices = @transform_2, window_bounds = array<i64: 8, 128>}, {pipeline_mode = #tpu.pipeline_mode<synchronous>, transform_indices = @transform_3, window_bounds = array<i64: 128, 512>}, {transform_indices = @transform_4, window_bounds = array<i64: 4, 8, 128>}, {pipeline_mode = #tpu.pipeline_mode<synchronous>, transform_indices = @transform_5, window_bounds = array<i64: 8, 128>}, {pipeline_mode = #tpu.pipeline_mode<synchronous>, transform_indices = @transform_6, window_bounds = array<i64: 8, 128>}]} {
    %c0_i32 = arith.constant 0 : i32
    %0 = arith.cmpi eq, %arg0, %c0_i32 : i32
    %1 = arith.extui %0 : i1 to i32
    %c0_i32_0 = arith.constant 0 : i32
    %2 = arith.cmpi ne, %1, %c0_i32_0 : i32
    scf.if %2 {
      %c0_83 = arith.constant 0 : index
      %c0_84 = arith.constant 0 : index
      %227 = vector.load %arg2[%c0_83, %c0_84] : memref<8x128xf32, #tpu.memory_space<vmem>>, vector<8x128xf32>
      %c0_85 = arith.constant 0 : index
      %c0_86 = arith.constant 0 : index
      %228 = vector.load %arg8[%c0_85, %c0_86] : memref<8x128xf32, #tpu.memory_space<vmem>>, vector<8x128xf32>
      tpu.vector_store %arg8[%c0_85, %c0_86], %227 {strides = array<i32>} : memref<8x128xf32, #tpu.memory_space<vmem>>, vector<8x128xf32>,
      %c0_87 = arith.constant 0 : index
      %c0_88 = arith.constant 0 : index
      %229 = vector.load %arg3[%c0_87, %c0_88] : memref<8x128xf32, #tpu.memory_space<vmem>>, vector<8x128xf32>
      %c0_89 = arith.constant 0 : index
      %c0_90 = arith.constant 0 : index
      %230 = vector.load %arg9[%c0_89, %c0_90] : memref<8x128xf32, #tpu.memory_space<vmem>>, vector<8x128xf32>
      tpu.vector_store %arg9[%c0_89, %c0_90], %229 {strides = array<i32>} : memref<8x128xf32, #tpu.memory_space<vmem>>, vector<8x128xf32>,
    } else {
    }
    %c0 = arith.constant 0 : index
    %c0_1 = arith.constant 0 : index
    %3 = vector.load %arg4[%c0, %c0_1] : memref<128x512xf32, #tpu.memory_space<vmem>>, vector<128x512xf32>
    %c0_i32_2 = arith.constant 0 : i32
    %c0_3 = arith.constant 0 : index
    %c0_4 = arith.constant 0 : index
    %4 = vector.load %arg8[%c0_3, %c0_4] : memref<8x128xf32, #tpu.memory_space<vmem>>, vector<8x128xf32>
    %c0_5 = arith.constant 0 : index
    %c0_6 = arith.constant 0 : index
    %5 = vector.load %arg9[%c0_5, %c0_6] : memref<8x128xf32, #tpu.memory_space<vmem>>, vector<8x128xf32>
    %6 = arith.index_cast %c0_i32_2 : i32 to index
    %c0_7 = arith.constant 0 : index
    %c0_8 = arith.constant 0 : index
    %7 = vector.load %arg1[%6, %c0_7, %c0_8] : memref<4x8x512xf32, #tpu.memory_space<vmem>>, vector<1x8x512xf32>
    %8 = vector.shape_cast %7 : vector<1x8x512xf32> to vector<8x512xf32>
    %cst = arith.constant dense<0.000000e+00> : vector<8x512xf32>
    %9 = tpu.matmul %4, %3, %cst {dimension_numbers = #tpu.dot_dimension_numbers<[1], [0], [0], [1], [0, 0, 1, 1], [], []>} : vector<8x128xf32>, vector<128x512xf32>, vector<8x512xf32> -> vector<8x512xf32>
    %10 = arith.addf %8, %9 : vector<8x512xf32>
    %11 = vector.extract_strided_slice %10 {offsets = [0, 0], sizes = [8, 128], strides = [1, 1]} : vector<8x512xf32> to vector<8x128xf32>
    %12 = arith.negf %11 : vector<8x128xf32>
    %13 = math.exp %12 : vector<8x128xf32>
    %cst_9 = arith.constant 1.000000e+00 : f32
    %14 = vector.broadcast %cst_9 : f32 to vector<8x128xf32>
    %15 = arith.addf %14, %13 : vector<8x128xf32>
    %16 = arith.divf %14, %15 : vector<8x128xf32>
    %17 = vector.extract_strided_slice %10 {offsets = [0, 128], sizes = [8, 128], strides = [1, 1]} : vector<8x512xf32> to vector<8x128xf32>
    %18 = arith.negf %17 : vector<8x128xf32>
    %19 = math.exp %18 : vector<8x128xf32>
    %cst_10 = arith.constant 1.000000e+00 : f32
    %20 = vector.broadcast %cst_10 : f32 to vector<8x128xf32>
    %21 = arith.addf %20, %19 : vector<8x128xf32>
    %22 = arith.divf %20, %21 : vector<8x128xf32>
    %23 = vector.extract_strided_slice %10 {offsets = [0, 256], sizes = [8, 128], strides = [1, 1]} : vector<8x512xf32> to vector<8x128xf32>
    %24 = math.tanh %23 : vector<8x128xf32>
    %25 = vector.extract_strided_slice %10 {offsets = [0, 384], sizes = [8, 128], strides = [1, 1]} : vector<8x512xf32> to vector<8x128xf32>
    %26 = arith.negf %25 : vector<8x128xf32>
    %27 = math.exp %26 : vector<8x128xf32>
    %cst_11 = arith.constant 1.000000e+00 : f32
    %28 = vector.broadcast %cst_11 : f32 to vector<8x128xf32>
    %29 = arith.addf %28, %27 : vector<8x128xf32>
    %30 = arith.divf %28, %29 : vector<8x128xf32>
    %31 = arith.mulf %22, %5 : vector<8x128xf32>
    %32 = arith.mulf %16, %24 : vector<8x128xf32>
    %33 = arith.addf %31, %32 : vector<8x128xf32>
    %34 = math.tanh %33 : vector<8x128xf32>
    %35 = arith.mulf %30, %34 : vector<8x128xf32>
    %c4_i32 = arith.constant 4 : i32
    %36 = arith.muli %arg0, %c4_i32 : i32
    %37 = arith.addi %36, %c0_i32_2 : i32
    %c10_i32 = arith.constant 10 : i32
    %38 = arith.cmpi slt, %37, %c10_i32 : i32
    %39 = arith.extui %38 : i1 to i32
    %40 = arith.sitofp %39 : i32 to f32
    %41 = vector.broadcast %40 : f32 to vector<8x128xf32>
    %42 = arith.mulf %41, %35 : vector<8x128xf32>
    %cst_12 = arith.constant 1.000000e+00 : f32
    %43 = arith.subf %cst_12, %40 : f32
    %44 = vector.broadcast %43 : f32 to vector<8x128xf32>
    %45 = arith.mulf %44, %4 : vector<8x128xf32>
    %46 = arith.addf %42, %45 : vector<8x128xf32>
    %c0_13 = arith.constant 0 : index
    %c0_14 = arith.constant 0 : index
    %47 = vector.load %arg8[%c0_13, %c0_14] : memref<8x128xf32, #tpu.memory_space<vmem>>, vector<8x128xf32>
    tpu.vector_store %arg8[%c0_13, %c0_14], %46 {strides = array<i32>} : memref<8x128xf32, #tpu.memory_space<vmem>>, vector<8x128xf32>,
    %48 = vector.broadcast %40 : f32 to vector<8x128xf32>
    %49 = arith.mulf %48, %33 : vector<8x128xf32>
    %cst_15 = arith.constant 1.000000e+00 : f32
    %50 = arith.subf %cst_15, %40 : f32
    %51 = vector.broadcast %50 : f32 to vector<8x128xf32>
    %52 = arith.mulf %51, %5 : vector<8x128xf32>
    %53 = arith.addf %49, %52 : vector<8x128xf32>
    %c0_16 = arith.constant 0 : index
    %c0_17 = arith.constant 0 : index
    %54 = vector.load %arg9[%c0_16, %c0_17] : memref<8x128xf32, #tpu.memory_space<vmem>>, vector<8x128xf32>
    tpu.vector_store %arg9[%c0_16, %c0_17], %53 {strides = array<i32>} : memref<8x128xf32, #tpu.memory_space<vmem>>, vector<8x128xf32>,
    %55 = arith.index_cast %c0_i32_2 : i32 to index
    %c0_18 = arith.constant 0 : index
    %c0_19 = arith.constant 0 : index
    %56 = vector.load %arg5[%55, %c0_18, %c0_19] : memref<4x8x128xf32, #tpu.memory_space<vmem>>, vector<1x8x128xf32>
    %57 = vector.shape_cast %56 : vector<1x8x128xf32> to vector<8x128xf32>
    %58 = vector.shape_cast %35 : vector<8x128xf32> to vector<1x8x128xf32>
    tpu.vector_store %arg5[%55, %c0_18, %c0_19], %58 {strides = array<i32>} : memref<4x8x128xf32, #tpu.memory_space<vmem>>, vector<1x8x128xf32>,
    %c1_i32 = arith.constant 1 : i32
    %c0_20 = arith.constant 0 : index
    %c0_21 = arith.constant 0 : index
    %59 = vector.load %arg8[%c0_20, %c0_21] : memref<8x128xf32, #tpu.memory_space<vmem>>, vector<8x128xf32>
    %c0_22 = arith.constant 0 : index
    %c0_23 = arith.constant 0 : index
    %60 = vector.load %arg9[%c0_22, %c0_23] : memref<8x128xf32, #tpu.memory_space<vmem>>, vector<8x128xf32>
    %61 = arith.index_cast %c1_i32 : i32 to index
    %c0_24 = arith.constant 0 : index
    %c0_25 = arith.constant 0 : index
    %62 = vector.load %arg1[%61, %c0_24, %c0_25] : memref<4x8x512xf32, #tpu.memory_space<vmem>>, vector<1x8x512xf32>
    %63 = vector.shape_cast %62 : vector<1x8x512xf32> to vector<8x512xf32>
    %cst_26 = arith.constant dense<0.000000e+00> : vector<8x512xf32>
    %64 = tpu.matmul %59, %3, %cst_26 {dimension_numbers = #tpu.dot_dimension_numbers<[1], [0], [0], [1], [0, 0, 1, 1], [], []>} : vector<8x128xf32>, vector<128x512xf32>, vector<8x512xf32> -> vector<8x512xf32>
    %65 = arith.addf %63, %64 : vector<8x512xf32>
    %66 = vector.extract_strided_slice %65 {offsets = [0, 0], sizes = [8, 128], strides = [1, 1]} : vector<8x512xf32> to vector<8x128xf32>
    %67 = arith.negf %66 : vector<8x128xf32>
    %68 = math.exp %67 : vector<8x128xf32>
    %cst_27 = arith.constant 1.000000e+00 : f32
    %69 = vector.broadcast %cst_27 : f32 to vector<8x128xf32>
    %70 = arith.addf %69, %68 : vector<8x128xf32>
    %71 = arith.divf %69, %70 : vector<8x128xf32>
    %72 = vector.extract_strided_slice %65 {offsets = [0, 128], sizes = [8, 128], strides = [1, 1]} : vector<8x512xf32> to vector<8x128xf32>
    %73 = arith.negf %72 : vector<8x128xf32>
    %74 = math.exp %73 : vector<8x128xf32>
    %cst_28 = arith.constant 1.000000e+00 : f32
    %75 = vector.broadcast %cst_28 : f32 to vector<8x128xf32>
    %76 = arith.addf %75, %74 : vector<8x128xf32>
    %77 = arith.divf %75, %76 : vector<8x128xf32>
    %78 = vector.extract_strided_slice %65 {offsets = [0, 256], sizes = [8, 128], strides = [1, 1]} : vector<8x512xf32> to vector<8x128xf32>
    %79 = math.tanh %78 : vector<8x128xf32>
    %80 = vector.extract_strided_slice %65 {offsets = [0, 384], sizes = [8, 128], strides = [1, 1]} : vector<8x512xf32> to vector<8x128xf32>
    %81 = arith.negf %80 : vector<8x128xf32>
    %82 = math.exp %81 : vector<8x128xf32>
    %cst_29 = arith.constant 1.000000e+00 : f32
    %83 = vector.broadcast %cst_29 : f32 to vector<8x128xf32>
    %84 = arith.addf %83, %82 : vector<8x128xf32>
    %85 = arith.divf %83, %84 : vector<8x128xf32>
    %86 = arith.mulf %77, %60 : vector<8x128xf32>
    %87 = arith.mulf %71, %79 : vector<8x128xf32>
    %88 = arith.addf %86, %87 : vector<8x128xf32>
    %89 = math.tanh %88 : vector<8x128xf32>
    %90 = arith.mulf %85, %89 : vector<8x128xf32>
    %c4_i32_30 = arith.constant 4 : i32
    %91 = arith.muli %arg0, %c4_i32_30 : i32
    %92 = arith.addi %91, %c1_i32 : i32
    %c10_i32_31 = arith.constant 10 : i32
    %93 = arith.cmpi slt, %92, %c10_i32_31 : i32
    %94 = arith.extui %93 : i1 to i32
    %95 = arith.sitofp %94 : i32 to f32
    %96 = vector.broadcast %95 : f32 to vector<8x128xf32>
    %97 = arith.mulf %96, %90 : vector<8x128xf32>
    %cst_32 = arith.constant 1.000000e+00 : f32
    %98 = arith.subf %cst_32, %95 : f32
    %99 = vector.broadcast %98 : f32 to vector<8x128xf32>
    %100 = arith.mulf %99, %59 : vector<8x128xf32>
    %101 = arith.addf %97, %100 : vector<8x128xf32>
    %c0_33 = arith.constant 0 : index
    %c0_34 = arith.constant 0 : index
    %102 = vector.load %arg8[%c0_33, %c0_34] : memref<8x128xf32, #tpu.memory_space<vmem>>, vector<8x128xf32>
    tpu.vector_store %arg8[%c0_33, %c0_34], %101 {strides = array<i32>} : memref<8x128xf32, #tpu.memory_space<vmem>>, vector<8x128xf32>,
    %103 = vector.broadcast %95 : f32 to vector<8x128xf32>
    %104 = arith.mulf %103, %88 : vector<8x128xf32>
    %cst_35 = arith.constant 1.000000e+00 : f32
    %105 = arith.subf %cst_35, %95 : f32
    %106 = vector.broadcast %105 : f32 to vector<8x128xf32>
    %107 = arith.mulf %106, %60 : vector<8x128xf32>
    %108 = arith.addf %104, %107 : vector<8x128xf32>
    %c0_36 = arith.constant 0 : index
    %c0_37 = arith.constant 0 : index
    %109 = vector.load %arg9[%c0_36, %c0_37] : memref<8x128xf32, #tpu.memory_space<vmem>>, vector<8x128xf32>
    tpu.vector_store %arg9[%c0_36, %c0_37], %108 {strides = array<i32>} : memref<8x128xf32, #tpu.memory_space<vmem>>, vector<8x128xf32>,
    %110 = arith.index_cast %c1_i32 : i32 to index
    %c0_38 = arith.constant 0 : index
    %c0_39 = arith.constant 0 : index
    %111 = vector.load %arg5[%110, %c0_38, %c0_39] : memref<4x8x128xf32, #tpu.memory_space<vmem>>, vector<1x8x128xf32>
    %112 = vector.shape_cast %111 : vector<1x8x128xf32> to vector<8x128xf32>
    %113 = vector.shape_cast %90 : vector<8x128xf32> to vector<1x8x128xf32>
    tpu.vector_store %arg5[%110, %c0_38, %c0_39], %113 {strides = array<i32>} : memref<4x8x128xf32, #tpu.memory_space<vmem>>, vector<1x8x128xf32>,
    %c2_i32 = arith.constant 2 : i32
    %c0_40 = arith.constant 0 : index
    %c0_41 = arith.constant 0 : index
    %114 = vector.load %arg8[%c0_40, %c0_41] : memref<8x128xf32, #tpu.memory_space<vmem>>, vector<8x128xf32>
    %c0_42 = arith.constant 0 : index
    %c0_43 = arith.constant 0 : index
    %115 = vector.load %arg9[%c0_42, %c0_43] : memref<8x128xf32, #tpu.memory_space<vmem>>, vector<8x128xf32>
    %116 = arith.index_cast %c2_i32 : i32 to index
    %c0_44 = arith.constant 0 : index
    %c0_45 = arith.constant 0 : index
    %117 = vector.load %arg1[%116, %c0_44, %c0_45] : memref<4x8x512xf32, #tpu.memory_space<vmem>>, vector<1x8x512xf32>
    %118 = vector.shape_cast %117 : vector<1x8x512xf32> to vector<8x512xf32>
    %cst_46 = arith.constant dense<0.000000e+00> : vector<8x512xf32>
    %119 = tpu.matmul %114, %3, %cst_46 {dimension_numbers = #tpu.dot_dimension_numbers<[1], [0], [0], [1], [0, 0, 1, 1], [], []>} : vector<8x128xf32>, vector<128x512xf32>, vector<8x512xf32> -> vector<8x512xf32>
    %120 = arith.addf %118, %119 : vector<8x512xf32>
    %121 = vector.extract_strided_slice %120 {offsets = [0, 0], sizes = [8, 128], strides = [1, 1]} : vector<8x512xf32> to vector<8x128xf32>
    %122 = arith.negf %121 : vector<8x128xf32>
    %123 = math.exp %122 : vector<8x128xf32>
    %cst_47 = arith.constant 1.000000e+00 : f32
    %124 = vector.broadcast %cst_47 : f32 to vector<8x128xf32>
    %125 = arith.addf %124, %123 : vector<8x128xf32>
    %126 = arith.divf %124, %125 : vector<8x128xf32>
    %127 = vector.extract_strided_slice %120 {offsets = [0, 128], sizes = [8, 128], strides = [1, 1]} : vector<8x512xf32> to vector<8x128xf32>
    %128 = arith.negf %127 : vector<8x128xf32>
    %129 = math.exp %128 : vector<8x128xf32>
    %cst_48 = arith.constant 1.000000e+00 : f32
    %130 = vector.broadcast %cst_48 : f32 to vector<8x128xf32>
    %131 = arith.addf %130, %129 : vector<8x128xf32>
    %132 = arith.divf %130, %131 : vector<8x128xf32>
    %133 = vector.extract_strided_slice %120 {offsets = [0, 256], sizes = [8, 128], strides = [1, 1]} : vector<8x512xf32> to vector<8x128xf32>
    %134 = math.tanh %133 : vector<8x128xf32>
    %135 = vector.extract_strided_slice %120 {offsets = [0, 384], sizes = [8, 128], strides = [1, 1]} : vector<8x512xf32> to vector<8x128xf32>
    %136 = arith.negf %135 : vector<8x128xf32>
    %137 = math.exp %136 : vector<8x128xf32>
    %cst_49 = arith.constant 1.000000e+00 : f32
    %138 = vector.broadcast %cst_49 : f32 to vector<8x128xf32>
    %139 = arith.addf %138, %137 : vector<8x128xf32>
    %140 = arith.divf %138, %139 : vector<8x128xf32>
    %141 = arith.mulf %132, %115 : vector<8x128xf32>
    %142 = arith.mulf %126, %134 : vector<8x128xf32>
    %143 = arith.addf %141, %142 : vector<8x128xf32>
    %144 = math.tanh %143 : vector<8x128xf32>
    %145 = arith.mulf %140, %144 : vector<8x128xf32>
    %c4_i32_50 = arith.constant 4 : i32
    %146 = arith.muli %arg0, %c4_i32_50 : i32
    %147 = arith.addi %146, %c2_i32 : i32
    %c10_i32_51 = arith.constant 10 : i32
    %148 = arith.cmpi slt, %147, %c10_i32_51 : i32
    %149 = arith.extui %148 : i1 to i32
    %150 = arith.sitofp %149 : i32 to f32
    %151 = vector.broadcast %150 : f32 to vector<8x128xf32>
    %152 = arith.mulf %151, %145 : vector<8x128xf32>
    %cst_52 = arith.constant 1.000000e+00 : f32
    %153 = arith.subf %cst_52, %150 : f32
    %154 = vector.broadcast %153 : f32 to vector<8x128xf32>
    %155 = arith.mulf %154, %114 : vector<8x128xf32>
    %156 = arith.addf %152, %155 : vector<8x128xf32>
    %c0_53 = arith.constant 0 : index
    %c0_54 = arith.constant 0 : index
    %157 = vector.load %arg8[%c0_53, %c0_54] : memref<8x128xf32, #tpu.memory_space<vmem>>, vector<8x128xf32>
    tpu.vector_store %arg8[%c0_53, %c0_54], %156 {strides = array<i32>} : memref<8x128xf32, #tpu.memory_space<vmem>>, vector<8x128xf32>,
    %158 = vector.broadcast %150 : f32 to vector<8x128xf32>
    %159 = arith.mulf %158, %143 : vector<8x128xf32>
    %cst_55 = arith.constant 1.000000e+00 : f32
    %160 = arith.subf %cst_55, %150 : f32
    %161 = vector.broadcast %160 : f32 to vector<8x128xf32>
    %162 = arith.mulf %161, %115 : vector<8x128xf32>
    %163 = arith.addf %159, %162 : vector<8x128xf32>
    %c0_56 = arith.constant 0 : index
    %c0_57 = arith.constant 0 : index
    %164 = vector.load %arg9[%c0_56, %c0_57] : memref<8x128xf32, #tpu.memory_space<vmem>>, vector<8x128xf32>
    tpu.vector_store %arg9[%c0_56, %c0_57], %163 {strides = array<i32>} : memref<8x128xf32, #tpu.memory_space<vmem>>, vector<8x128xf32>,
    %165 = arith.index_cast %c2_i32 : i32 to index
    %c0_58 = arith.constant 0 : index
    %c0_59 = arith.constant 0 : index
    %166 = vector.load %arg5[%165, %c0_58, %c0_59] : memref<4x8x128xf32, #tpu.memory_space<vmem>>, vector<1x8x128xf32>
    %167 = vector.shape_cast %166 : vector<1x8x128xf32> to vector<8x128xf32>
    %168 = vector.shape_cast %145 : vector<8x128xf32> to vector<1x8x128xf32>
    tpu.vector_store %arg5[%165, %c0_58, %c0_59], %168 {strides = array<i32>} : memref<4x8x128xf32, #tpu.memory_space<vmem>>, vector<1x8x128xf32>,
    %c3_i32 = arith.constant 3 : i32
    %c0_60 = arith.constant 0 : index
    %c0_61 = arith.constant 0 : index
    %169 = vector.load %arg8[%c0_60, %c0_61] : memref<8x128xf32, #tpu.memory_space<vmem>>, vector<8x128xf32>
    %c0_62 = arith.constant 0 : index
    %c0_63 = arith.constant 0 : index
    %170 = vector.load %arg9[%c0_62, %c0_63] : memref<8x128xf32, #tpu.memory_space<vmem>>, vector<8x128xf32>
    %171 = arith.index_cast %c3_i32 : i32 to index
    %c0_64 = arith.constant 0 : index
    %c0_65 = arith.constant 0 : index
    %172 = vector.load %arg1[%171, %c0_64, %c0_65] : memref<4x8x512xf32, #tpu.memory_space<vmem>>, vector<1x8x512xf32>
    %173 = vector.shape_cast %172 : vector<1x8x512xf32> to vector<8x512xf32>
    %cst_66 = arith.constant dense<0.000000e+00> : vector<8x512xf32>
    %174 = tpu.matmul %169, %3, %cst_66 {dimension_numbers = #tpu.dot_dimension_numbers<[1], [0], [0], [1], [0, 0, 1, 1], [], []>} : vector<8x128xf32>, vector<128x512xf32>, vector<8x512xf32> -> vector<8x512xf32>
    %175 = arith.addf %173, %174 : vector<8x512xf32>
    %176 = vector.extract_strided_slice %175 {offsets = [0, 0], sizes = [8, 128], strides = [1, 1]} : vector<8x512xf32> to vector<8x128xf32>
    %177 = arith.negf %176 : vector<8x128xf32>
    %178 = math.exp %177 : vector<8x128xf32>
    %cst_67 = arith.constant 1.000000e+00 : f32
    %179 = vector.broadcast %cst_67 : f32 to vector<8x128xf32>
    %180 = arith.addf %179, %178 : vector<8x128xf32>
    %181 = arith.divf %179, %180 : vector<8x128xf32>
    %182 = vector.extract_strided_slice %175 {offsets = [0, 128], sizes = [8, 128], strides = [1, 1]} : vector<8x512xf32> to vector<8x128xf32>
    %183 = arith.negf %182 : vector<8x128xf32>
    %184 = math.exp %183 : vector<8x128xf32>
    %cst_68 = arith.constant 1.000000e+00 : f32
    %185 = vector.broadcast %cst_68 : f32 to vector<8x128xf32>
    %186 = arith.addf %185, %184 : vector<8x128xf32>
    %187 = arith.divf %185, %186 : vector<8x128xf32>
    %188 = vector.extract_strided_slice %175 {offsets = [0, 256], sizes = [8, 128], strides = [1, 1]} : vector<8x512xf32> to vector<8x128xf32>
    %189 = math.tanh %188 : vector<8x128xf32>
    %190 = vector.extract_strided_slice %175 {offsets = [0, 384], sizes = [8, 128], strides = [1, 1]} : vector<8x512xf32> to vector<8x128xf32>
    %191 = arith.negf %190 : vector<8x128xf32>
    %192 = math.exp %191 : vector<8x128xf32>
    %cst_69 = arith.constant 1.000000e+00 : f32
    %193 = vector.broadcast %cst_69 : f32 to vector<8x128xf32>
    %194 = arith.addf %193, %192 : vector<8x128xf32>
    %195 = arith.divf %193, %194 : vector<8x128xf32>
    %196 = arith.mulf %187, %170 : vector<8x128xf32>
    %197 = arith.mulf %181, %189 : vector<8x128xf32>
    %198 = arith.addf %196, %197 : vector<8x128xf32>
    %199 = math.tanh %198 : vector<8x128xf32>
    %200 = arith.mulf %195, %199 : vector<8x128xf32>
    %c4_i32_70 = arith.constant 4 : i32
    %201 = arith.muli %arg0, %c4_i32_70 : i32
    %202 = arith.addi %201, %c3_i32 : i32
    %c10_i32_71 = arith.constant 10 : i32
    %203 = arith.cmpi slt, %202, %c10_i32_71 : i32
    %204 = arith.extui %203 : i1 to i32
    %205 = arith.sitofp %204 : i32 to f32
    %206 = vector.broadcast %205 : f32 to vector<8x128xf32>
    %207 = arith.mulf %206, %200 : vector<8x128xf32>
    %cst_72 = arith.constant 1.000000e+00 : f32
    %208 = arith.subf %cst_72, %205 : f32
    %209 = vector.broadcast %208 : f32 to vector<8x128xf32>
    %210 = arith.mulf %209, %169 : vector<8x128xf32>
    %211 = arith.addf %207, %210 : vector<8x128xf32>
    %c0_73 = arith.constant 0 : index
    %c0_74 = arith.constant 0 : index
    %212 = vector.load %arg8[%c0_73, %c0_74] : memref<8x128xf32, #tpu.memory_space<vmem>>, vector<8x128xf32>
    tpu.vector_store %arg8[%c0_73, %c0_74], %211 {strides = array<i32>} : memref<8x128xf32, #tpu.memory_space<vmem>>, vector<8x128xf32>,
    %213 = vector.broadcast %205 : f32 to vector<8x128xf32>
    %214 = arith.mulf %213, %198 : vector<8x128xf32>
    %cst_75 = arith.constant 1.000000e+00 : f32
    %215 = arith.subf %cst_75, %205 : f32
    %216 = vector.broadcast %215 : f32 to vector<8x128xf32>
    %217 = arith.mulf %216, %170 : vector<8x128xf32>
    %218 = arith.addf %214, %217 : vector<8x128xf32>
    %c0_76 = arith.constant 0 : index
    %c0_77 = arith.constant 0 : index
    %219 = vector.load %arg9[%c0_76, %c0_77] : memref<8x128xf32, #tpu.memory_space<vmem>>, vector<8x128xf32>
    tpu.vector_store %arg9[%c0_76, %c0_77], %218 {strides = array<i32>} : memref<8x128xf32, #tpu.memory_space<vmem>>, vector<8x128xf32>,
    %220 = arith.index_cast %c3_i32 : i32 to index
    %c0_78 = arith.constant 0 : index
    %c0_79 = arith.constant 0 : index
    %221 = vector.load %arg5[%220, %c0_78, %c0_79] : memref<4x8x128xf32, #tpu.memory_space<vmem>>, vector<1x8x128xf32>
    %222 = vector.shape_cast %221 : vector<1x8x128xf32> to vector<8x128xf32>
    %223 = vector.shape_cast %200 : vector<8x128xf32> to vector<1x8x128xf32>
    tpu.vector_store %arg5[%220, %c0_78, %c0_79], %223 {strides = array<i32>} : memref<4x8x128xf32, #tpu.memory_space<vmem>>, vector<1x8x128xf32>,
    %c4_i32_80 = arith.constant 4 : i32
    %c2_i32_81 = arith.constant 2 : i32
    %224 = arith.cmpi eq, %arg0, %c2_i32_81 : i32
    %225 = arith.extui %224 : i1 to i32
    %c0_i32_82 = arith.constant 0 : i32
    %226 = arith.cmpi ne, %225, %c0_i32_82 : i32
    scf.if %226 {
      %c0_83 = arith.constant 0 : index
      %c0_84 = arith.constant 0 : index
      %227 = vector.load %arg8[%c0_83, %c0_84] : memref<8x128xf32, #tpu.memory_space<vmem>>, vector<8x128xf32>
      %c0_85 = arith.constant 0 : index
      %c0_86 = arith.constant 0 : index
      %228 = vector.load %arg6[%c0_85, %c0_86] : memref<8x128xf32, #tpu.memory_space<vmem>>, vector<8x128xf32>
      tpu.vector_store %arg6[%c0_85, %c0_86], %227 {strides = array<i32>} : memref<8x128xf32, #tpu.memory_space<vmem>>, vector<8x128xf32>,
      %c0_87 = arith.constant 0 : index
      %c0_88 = arith.constant 0 : index
      %229 = vector.load %arg9[%c0_87, %c0_88] : memref<8x128xf32, #tpu.memory_space<vmem>>, vector<8x128xf32>
      %c0_89 = arith.constant 0 : index
      %c0_90 = arith.constant 0 : index
      %230 = vector.load %arg7[%c0_89, %c0_90] : memref<8x128xf32, #tpu.memory_space<vmem>>, vector<8x128xf32>
      tpu.vector_store %arg7[%c0_89, %c0_90], %229 {strides = array<i32>} : memref<8x128xf32, #tpu.memory_space<vmem>>, vector<8x128xf32>,
    } else {
    }
    return
  }
  func.func @transform_0(%arg0: i32) -> (i32, i32, i32) {
    %c0_i32 = arith.constant 0 : i32
    %c0_i32_0 = arith.constant 0 : i32
    %c0_i32_1 = arith.constant 0 : i32
    return %arg0, %c0_i32, %c0_i32_0 : i32, i32, i32
  }
  func.func @transform_1(%arg0: i32) -> (i32, i32) {
    %c0_i32 = arith.constant 0 : i32
    %c0_i32_0 = arith.constant 0 : i32
    %c0_i32_1 = arith.constant 0 : i32
    return %c0_i32, %c0_i32_0 : i32, i32
  }
  func.func @transform_2(%arg0: i32) -> (i32, i32) {
    %c0_i32 = arith.constant 0 : i32
    %c0_i32_0 = arith.constant 0 : i32
    %c0_i32_1 = arith.constant 0 : i32
    return %c0_i32, %c0_i32_0 : i32, i32
  }
  func.func @transform_3(%arg0: i32) -> (i32, i32) {
    %c0_i32 = arith.constant 0 : i32
    %c0_i32_0 = arith.constant 0 : i32
    %c0_i32_1 = arith.constant 0 : i32
    return %c0_i32, %c0_i32_0 : i32, i32
  }
  func.func @transform_4(%arg0: i32) -> (i32, i32, i32) {
    %c0_i32 = arith.constant 0 : i32
    %c0_i32_0 = arith.constant 0 : i32
    %c0_i32_1 = arith.constant 0 : i32
    return %arg0, %c0_i32, %c0_i32_0 : i32, i32, i32
  }
  func.func @transform_5(%arg0: i32) -> (i32, i32) {
    %c0_i32 = arith.constant 0 : i32
    %c0_i32_0 = arith.constant 0 : i32
    %c0_i32_1 = arith.constant 0 : i32
    return %c0_i32, %c0_i32_0 : i32, i32
  }
  func.func @transform_6(%arg0: i32) -> (i32, i32) {
    %c0_i32 = arith.constant 0 : i32
    %c0_i32_0 = arith.constant 0 : i32
    %c0_i32_1 = arith.constant 0 : i32
    return %c0_i32, %c0_i32_0 : i32, i32
  }
}

</mosaic_0001>

<bundles_post_ra>
// kernel: tpu_custom_call.1
= control target key start
LH: loop header
LB: loop body
LE: loop exit
PB: predicated region body
PF: predicated region fallthrough
CT: control target
= control target key end

     0   :  { %12 = vsyncpa [#allocation5], 0  ;;  %s2649_s0 = inlined_call_operand.hbm [shape: f32[12,8,512], index: 0, kind: input, shape index: {}]   ;;  %s2650_s1 = inlined_call_operand.hbm [shape: f32[8,128], index: 1, kind: input, shape index: {}]   ;;  %s2651_s2 = inlined_call_operand.hbm [shape: f32[8,128], index: 2, kind: input, shape index: {}]   ;;  %s2652_s3 = inlined_call_operand.hbm [shape: f32[128,512], index: 3, kind: input, shape index: {}]   ;;  %s2653_s4 = inlined_call_operand.hbm [shape: f32[12,8,128], index: 4, kind: output, shape index: {0}]   ;;  %s2654_s5 = inlined_call_operand.hbm [shape: f32[8,128], index: 5, kind: output, shape index: {1}]   ;;  %s2655_s6 = inlined_call_operand.hbm [shape: f32[8,128], index: 6, kind: output, shape index: {2}]  }
   0x1   :  { %14 = vsyncpa [#allocation5 + $0x1], 0 }
   0x2   :  { %15 = vsyncpa [#allocation8], 0 }
   0x3   :  { %16 = vsyncpa [#allocation11], 0 }
   0x4   :  { %17 = vsyncpa [#allocation6], 0 }
   0x5   :  { %19 = vsyncpa [#allocation6 + $0x1], 0 }
   0x6   :  { %20 = vsyncpa [#allocation14], 0  ;;  %s2089_s21 = smov 0   ;;  %s2091_s22 = smov 0  }
   0x7   :  { %s2093_s23 = smov 0   ;;  %s2095_s24 = smov 0  }
   0x8 LB: > { %s2110_s25 = sadd.s32 4294967295, %s2040_s24   ;;  %s1322_s26 = sadd.s32 4294967294, %s2040_s24   ;;  %s2040_s24 = sphi %s2095_s24, %s2684_s24   ;;  %s2036_s23 = sphi %s2093_s23, %s2683_s23   ;;  %s2032_s22 = sphi %s2091_s22, %s2682_s22   ;;  %s2028_s21 = sphi %s2089_s21, %s2681_s21  }
   0x9   : > { %p46_p0 = scmp.ne.s32.totalorder %s2032_s22, %s2028_s21  ;;  %p2656_p1 = scmp.eq.s32.totalorder %s2110_s25, 0 }
   0xa   : > { %p139_p3 = scmp.eq.s32.totalorder %s1322_s26, 2  ;;  %p1323_p5 = scmp.ge.s32.totalorder %s2040_s24, 1 }
   0xb   : > { %p2119_p4 = por %p2656_p1, %p46_p0  ;;  %p188_p7 = scmp.lt.s32.totalorder %s2040_s24, 4 }
   0xc   : > { %p2124_p6 = por %p139_p3, %p46_p0  ;;  %s2042_s30 = smov [#allocation7]  }
   0xd   : > { %s2659_s27 = scalar_select %p2119_p4, 1, 0 }
   0xe   : > { %s2660_s28 = scalar_select %p2124_p6, 1, 0 }
   0xf   : > { %p2130_p9 = pnand %p1323_p5, %p188_p7  ;;  %s201_s7 = sshll.u32 %s2042_s30, 4  ;;  %s202_s7 = int_to_ptr.vmem [resolvable:$true] %s201_s7 }
  0x10   : > { %s2043_s8 = smov [#allocation9]   ;;  %s2044_s11 = smov [#allocation10]  }
  0x11   : > { %s2661_s29 = scalar_select %p2130_p9, 1, 0 }
  0x12   : > { %p1660_p10 = pneg %p2130_p9  ;;  %s212_s9 = sshll.u32 %s2043_s8, 4  ;;  %s2142_s9 = int_to_ptr.vmem [resolvable:$true] %s212_s9 }
  0x13   : > { %s222_s12 = sshll.u32 %s2044_s11, 4  ;;  %s1796_s15 = scalar_lea.hbm %s2650_s1, 128  ;;  %s2144_s12 = int_to_ptr.vmem [resolvable:$true] %s222_s12 }
  0x14   : > { %p2138_p11 = pnand %p1660_p10, %p2656_p1  ;;  %p1797_p12 = scmp.ne.s32.totalorder %s2650_s1, %s1796_s15 }
  0x15   : > { %p1803_p5 = scmp.lt.u32.totalorder %s1796_s15, %s2650_s1 }
  0x16   : > { %p2154_p13 = pneg %p2138_p11 }
  0x18   : > { %p1799_p0 = pnand %p2154_p13, %p1797_p12 }
  0x1a   : > { %p1800_p3 = pneg %p1799_p0 }
  0x1c   : > { %p1805_p7 = pnand %p1803_p5, %p1800_p3 }
  0x1e   : > { %1808 = shalt.err (!%p1805_p7)
}
  0x1f   : > { %s1809_s26 = scalar_lea.vmem %s202_s7, 128  ;;  %p1817_p2 = scmp.lt.s32.totalorder %s202_s7, %s202_s7 }
  0x20   : > { %p1810_p10 = scmp.ne.s32.totalorder %s202_s7, %s1809_s26  ;;  %p1818_p6 = scmp.lt.s32.totalorder %s1809_s26, %s1809_s26 }
  0x22   : > { %p1812_p8 = pnand %p1810_p10, %p2154_p13  ;;  %p1819_p4 = por %p1818_p6, %p1817_p2 }
  0x24   : > { %p1813_p1 = pneg %p1812_p8 }
  0x26   : > { %p1820_p9 = pnand %p1819_p4, %p1813_p1 }
  0x28   : > { %1823 = shalt.err (!%p1820_p9)
}
  0x29   : > { %1663 = dma.hbm_to_vmem [thread:$0]  (!%p2138_p11), %s2650_s1, 128, %s202_s7, [#allocation8]  }
  0x2a   : > { %s1824_s14 = scalar_lea.hbm %s2651_s2, 128 }
  0x2b   : > { %p1825_p8 = scmp.ne.s32.totalorder %s2651_s2, %s1824_s14  ;;  %p1831_p1 = scmp.lt.u32.totalorder %s1824_s14, %s2651_s2 }
  0x2d   : > { %p1827_p12 = pnand %p1825_p8, %p2154_p13 }
  0x2f   : > { %p1828_p2 = pneg %p1827_p12 }
  0x31   : > { %p1833_p4 = pnand %p1831_p1, %p1828_p2 }
  0x33   : > { %1836 = shalt.err (!%p1833_p4)
}
  0x34   : > { %s1837_s7 = scalar_lea.vmem %s2142_s9, 128  ;;  %p1845_p3 = scmp.lt.s32.totalorder %s2142_s9, %s2142_s9 }
  0x35   : > { %p1838_p6 = scmp.ne.s32.totalorder %s2142_s9, %s1837_s7  ;;  %p1846_p5 = scmp.lt.s32.totalorder %s1837_s7, %s1837_s7 }
  0x37   : > { %p1840_p9 = pnand %p1838_p6, %p2154_p13  ;;  %p1847_p7 = por %p1846_p5, %p1845_p3 }
  0x39   : > { %p1841_p0 = pneg %p1840_p9 }
  0x3b   : > { %p1848_p10 = pnand %p1847_p7, %p1841_p0 }
  0x3d   : > { %1851 = shalt.err (!%p1848_p10)
}
  0x3e   : > { %1666 = dma.hbm_to_vmem [thread:$0]  (!%p2138_p11), %s2651_s2, 128, %s2142_s9, [#allocation8]  }
  0x3f   : > { %s1852_s11 = scalar_lea.hbm %s2652_s3, 8192 }
  0x40   : > { %p1853_p8 = scmp.ne.s32.totalorder %s2652_s3, %s1852_s11  ;;  %p1859_p1 = scmp.lt.u32.totalorder %s1852_s11, %s2652_s3 }
  0x42   : > { %p1855_p12 = pnand %p1853_p8, %p2154_p13 }
  0x44   : > { %p1856_p2 = pneg %p1855_p12 }
  0x46   : > { %p1861_p4 = pnand %p1859_p1, %p1856_p2 }
  0x48   : > { %1864 = shalt.err (!%p1861_p4)
}
  0x49   : > { %s1865_s9 = scalar_lea.vmem %s2144_s12, 8192  ;;  %p1873_p3 = scmp.lt.s32.totalorder %s2144_s12, %s2144_s12 }
  0x4a   : > { %p1866_p6 = scmp.ne.s32.totalorder %s2144_s12, %s1865_s9  ;;  %p1874_p5 = scmp.lt.s32.totalorder %s1865_s9, %s1865_s9 }
  0x4c   : > { %p1868_p9 = pnand %p1866_p6, %p2154_p13  ;;  %p1875_p7 = por %p1874_p5, %p1873_p3 }
  0x4e   : > { %p1869_p0 = pneg %p1868_p9 }
  0x50   : > { %p1876_p10 = pnand %p1875_p7, %p1869_p0 }
  0x52   : > { %1879 = shalt.err (!%p1876_p10)
}
  0x53   : > { %s2045_s17 = smov 512   ;;  %s2046_s18 = smov 32  }
  0x54   : > { %1669 = dma.hbm_to_vmem [thread:$0]  (!%p2138_p11), %s2652_s3, 8192, %s2144_s12, [#allocation11], %s2045_s17, %s2045_s17, %s2046_s18  }
  0x55   : > { %s2220_s20 = sadd.s32 1, %s2040_s24   ;;  %s33_s30 = sadd.s32 1, %s2036_s23 }
  0x56   : > { %s30_s26 = ssub.s32 %s2040_s24, %s2220_s20  ;;  %p40_p8 = scmp.ne.s32.totalorder %s2036_s23, %s2032_s22 }
  0x57   : > { %p31_p13 = scmp.eq.s32.totalorder %s30_s26, 0  ;;  %p41_p12 = scmp.eq.s32.totalorder %s2040_s24, 0 }
  0x58   : > { %p1681_p2 = scmp.lt.s32.totalorder %s2040_s24, 3  ;;  %p2664_p4 = scmp.eq.s32.totalorder %s2110_s25, 2 }
  0x59   : > { %s2230_s8 = scalar_select %p31_p13, %s2036_s23, %s33_s30  }
  0x5a   : > { %p42_p1 = por %p41_p12, %p40_p8  ;;  %p2234_p6 = por %p2664_p4, %p40_p8 }
  0x5b   : > { %s236_s11 = sand.u32 1, %s2036_s23   ;;  %s1378_s13 = sshll.u32 %s2040_s24, 11 }
  0x5c   : > { %s1328_s12 = sshll.u32 %s236_s11, 7  ;;  %s2243_s16 = scalar_lea.hbm %s2649_s0, %s1378_s13 }
  0x5d   : > { %s240_s9 = scalar_lea.vmem [#allocation4], %s1328_s12  ;;  %p2245_p11 = pnand %p1681_p2, %p42_p1 }
  0x5e   : > { %s248_s19 = sshll.u32 %s240_s9, 4  ;;  %s2251_s26 = scalar_lea.sflag [#allocation5], %s236_s11  ;;  %s2249_s19 = int_to_ptr.vmem [resolvable:$true] %s248_s19 }
  0x5f   : > { %s1880_s30 = scalar_lea.hbm %s2243_s16, 2048  ;;  %p1882_p0 = pneg %p2245_p11 }
  0x60   : > { %p1881_p9 = scmp.ne.s32.totalorder %s2243_s16, %s1880_s30  ;;  %s1885_s14 = scalar_lea.hbm %s2649_s0, 6144 }
  0x61   : > { %p1886_p7 = scmp.lt.u32.totalorder %s2243_s16, %s2649_s0  ;;  %p1887_p10 = scmp.lt.u32.totalorder %s1885_s14, %s1880_s30 }
  0x62   : > { %p1883_p3 = pnand %p1882_p0, %p1881_p9  ;;  %p1889_p8 = scmp.lt.u32.totalorder %s1880_s30, %s2243_s16 }
  0x63   : > { %p1888_p13 = por %p1887_p10, %p1886_p7 }
  0x64   : > { %p1884_p5 = pneg %p1883_p3 }
  0x65   : > { %p1890_p12 = por %p1889_p8, %p1888_p13 }
  0x67   : > { %p1891_p2 = pnand %p1890_p12, %p1884_p5 }
  0x69   : > { %1894 = shalt.err (!%p1891_p2)
}
  0x6a   : > { %s1895_s11 = scalar_lea.vmem %s2249_s19, 2048  ;;  %s2047_s13 = smov [#allocation4]  }
  0x6b   : > { %p1896_p1 = scmp.ne.s32.totalorder %s2249_s19, %s1895_s11  ;;  %s1900_s12 = sshll.u32 %s2047_s13, 4  ;;  %s1901_s12 = int_to_ptr.vmem [resolvable:$false] %s1900_s12 }
  0x6c   : > { %s1902_s15 = scalar_lea.vmem %s1901_s12, 4096  ;;  %p1903_p3 = scmp.lt.s32.totalorder %s2249_s19, %s1901_s12 }
  0x6d   : > { %p1898_p4 = pnand %p1896_p1, %p1882_p0  ;;  %p1904_p7 = scmp.lt.s32.totalorder %s1902_s15, %s1895_s11 }
  0x6f   : > { %p1899_p9 = pneg %p1898_p4  ;;  %p1905_p10 = por %p1904_p7, %p1903_p3 }
  0x71   : > { %p1906_p13 = pnand %p1905_p10, %p1899_p9 }
  0x73   : > { %1909 = shalt.err (!%p1906_p13)
}
  0x74   : > { %1673 = dma.hbm_to_vmem [thread:$0]  (!%p2245_p11), %s2243_s16, 2048, %s2249_s19, %s2251_s26, %s2045_s17, %s2045_s17, %s2046_s18  }
  0x75   : > { %p2667_p0 = scmp.ne.s32.totalorder %s2661_s29, 0 }
  0x76   : > { %s2285_s30 = sand.u32 (!%p2667_p0), 1, %s2032_s22   ;;  %p2668_p5 = scmp.ne.s32.totalorder (!%p2667_p0), %s2659_s27, 0 }
  0x77   : > { %260 = sbr.rel (%p2667_p0) target bundleno = 1311 (0x51f), region = 36  ;;  %s1333_s14 = sshll.u32 (!%p2667_p0), %s2285_s30, 7 }
  0x78   : > { %s263_s9 = scalar_lea.sflag (!%p2667_p0), [#allocation5], %s2285_s30  ;;  %s2289_s11 = scalar_lea.vmem (!%p2667_p0), [#allocation4], %s1333_s14 }
  0x7e   : > { %2007 = dma.done.wait (%p2668_p5), %s263_s9, 2048  }
  0x7f   : > { %2009 = vsyncadd (%p2668_p5), %s263_s9, 4294965248  ;;  %p2669_p11 = scmp.eq.s32.totalorder %s2110_s25, 0 }
  0x81   : > { %2011 = dma.done.wait (%p2669_p11), [#allocation8], 256   ;;  %p2670_p8 = pmov %p2669_p11 }
  0x83   : > { %2013 = vsyncadd (%p2670_p8), [#allocation8], 4294967040  ;;  %p2671_p12 = pmov %p2670_p8 }
  0x84   : > { %p2672_p2 = pmov %p2670_p8 }
  0x85   : > { %2015 = dma.done.wait (%p2671_p12), [#allocation11], 8192  }
  0x86   : > { %2017 = vsyncadd (%p2672_p2), [#allocation11], 4294959104  ;;  %s1337_s29 = sshll.u32 %s2285_s30, 5  ;;  %p2673_p1 = scmp.ne.s32.totalorder %s2110_s25, 0 }
  0x87   : > { %s2304_s17 = scalar_lea.vmem [#allocation12], %s1337_s29  ;;  %v313_v0 = vld [vmem:[#allocation7] sm:$0xff] (!%p2673_p1)  ;;  %v315_v1 = vld [vmem:[#allocation9] sm:$0xff] (!%p2673_p1) }
  0x88   : > { %312 = sbr.rel (%p2673_p1) target bundleno = 143 (0x8f), region = 56  ;;  %314 = vst [vmem:[#allocation2] sm:$0xff] (!%p2673_p1), %v313_v0  ;;  %316 = vst [vmem:[#allocation3] sm:$0xff] (!%p2673_p1), %v315_v1 }
  0x8f PF: > { %v318_v2 = vld [vmem:[#allocation10 + $0x8] sm:$0xff]  ;;  %v317_v4 = vld [vmem:[#allocation10] sm:$0xff]  ;;  %v2048_v9 = vmov 0.0   ;;  %v320_v21 = vld [vmem:[#allocation10 + $0x18] sm:$0xff]  ;;  %s2451_s27 = sshll.u32 %s2110_s25, 2  ;;  %p1367_p10 = scmp.ne.s32.totalorder %s2110_s25, 2 }
  0x90   : > { %v322_v3 = vld [vmem:[#allocation10 + $0x28] sm:$0xff]  ;;  %v321_v6 = vld [vmem:[#allocation10 + $0x20] sm:$0xff]  ;;  %451 = vmatprep.mubr.f32.mxu0 %v2048_v9  ;;  %522 = vmatprep.mubr.f32.mxu1 %v2048_v9  ;;  %v324_v22 = vld [vmem:[#allocation10 + $0x38] sm:$0xff]  ;;  %p558_p4 = scmp.lt.s32.totalorder %s2451_s27, 10  ;;  %s750_s7 = sadd.s32 1, %s2451_s27 }
  0x91   : > { %v2308_v5 = vpack.c.bf16 %v322_v3, %v318_v2  ;;  %v326_v7 = vld [vmem:[#allocation10 + $0x48] sm:$0xff]  ;;  %v2312_v10 = vpack.c.bf16 %v321_v6, %v317_v4  ;;  %v325_v12 = vld [vmem:[#allocation10 + $0x40] sm:$0xff]  ;;  %v2323_v24 = vpack.c.bf16 %v324_v22, %v320_v21  ;;  %v319_v25 = vld [vmem:[#allocation10 + $0x10] sm:$0xff]  ;;  %p751_p9 = scmp.lt.s32.totalorder %s750_s7, 10  ;;  %s944_s15 = sadd.s32 2, %s2451_s27 }
  0x92   : > { %v330_v8 = vld [vmem:[#allocation10 + $0x68] sm:$0xff]  ;;  %v329_v13 = vld [vmem:[#allocation10 + $0x60] sm:$0xff]  ;;  %v323_v26 = vld [vmem:[#allocation10 + $0x30] sm:$0xff]  ;;  %s559_s18 = scalar_select %p558_p4, 1, 0 }
  0x93   : > { %v2314_v11 = vpack.c.bf16 %v330_v8, %v326_v7  ;;  %v334_v14 = vld [vmem:[#allocation10 + $0x88] sm:$0xff]  ;;  %1381 = vmatprep.subr.bf16.mxu0 %v2308_v5  ;;  %v2318_v16 = vpack.c.bf16 %v329_v13, %v325_v12  ;;  %v333_v17 = vld [vmem:[#allocation10 + $0x80] sm:$0xff]  ;;  %v2325_v27 = vpack.c.bf16 %v323_v26, %v319_v25  ;;  %1413 = vmatprep.subr.bf16.mxu1 %v2323_v24  ;;  %v328_v29 = vld [vmem:[#allocation10 + $0x58] sm:$0xff]  ;;  %s752_s26 = scalar_select %p751_p9, 1, 0 }
  0x94   : > { %v338_v15 = vld [vmem:[#allocation10 + $0xa8] sm:$0xff]  ;;  %1383 = vmatpush1.bf16.msra.mxu0 %v2312_v10  ;;  %v337_v18 = vld [vmem:[#allocation10 + $0xa0] sm:$0xff]  ;;  %v332_v30 = vld [vmem:[#allocation10 + $0x78] sm:$0xff]  ;;  %s560_s16 = scvt.s32.f32 %s559_s18  ;;  %p945_p3 = scmp.lt.s32.totalorder %s944_s15, 10 }
  0x95   : > { %1385 = vmatprep.subr.bf16.mxu0 %v2314_v11  ;;  %v2321_v19 = vpack.c.bf16 %v338_v15, %v334_v14  ;;  %v342_v20 = vld [vmem:[#allocation10 + $0xc8] sm:$0xff]  ;;  %v2328_v28 = vpack.c.bf16 %v337_v18, %v333_v17  ;;  %v327_v31 = vld [vmem:[#allocation10 + $0x50] sm:$0xff]  ;;  %v341_v33 = vld [vmem:[#allocation10 + $0xc0] sm:$0xff]  ;;  %1415 = vmatpush1.bf16.msra.mxu1 %v2325_v27  ;;  %v2335_v35 = vpack.c.bf16 %v332_v30, %v328_v29  ;;  %s753_s13 = scvt.s32.f32 %s752_s26  ;;  %s1138_s18 = sadd.s32 3, %s2451_s27 }
  0x96   : > { %v346_v23 = vld [vmem:[#allocation10 + $0xe8] sm:$0xff]  ;;  %v345_v34 = vld [vmem:[#allocation10 + $0xe0] sm:$0xff]  ;;  %v331_v36 = vld [vmem:[#allocation10 + $0x70] sm:$0xff]  ;;  %s563_s19 = ssub.f32 1.0, %s560_s16  ;;  %p1139_p7 = scmp.lt.s32.totalorder %s1138_s18, 10 }
  0x97   : > { %v2332_v32 = vpack.c.bf16 %v346_v23, %v342_v20  ;;  %v350_v37 = vld [vmem:[#allocation10 + $0x108] sm:$0xff]  ;;  %v2337_v39 = vpack.c.bf16 %v331_v36, %v327_v31  ;;  %v336_v40 = vld [vmem:[#allocation10 + $0x98] sm:$0xff]  ;;  %1417 = vmatprep.subr.bf16.mxu1 %v2335_v35  ;;  %v335_v42 = vld [vmem:[#allocation10 + $0x90] sm:$0xff]  ;;  %v2341_v44 = vpack.c.bf16 %v345_v34, %v341_v33  ;;  %s756_s12 = ssub.f32 1.0, %s753_s13 }
  0x98   : > { %1387 = vmatpush1.bf16.msra.mxu0 %v2318_v16  ;;  %v354_v38 = vld [vmem:[#allocation10 + $0x128] sm:$0xff]  ;;  %v340_v41 = vld [vmem:[#allocation10 + $0xb8] sm:$0xff]  ;;  %v339_v43 = vld [vmem:[#allocation10 + $0xb0] sm:$0xff]  ;;  %s946_s14 = scalar_select %p945_p3, 1, 0 }
  0x99   : > { %1389 = vmatprep.subr.bf16.mxu0 %v2321_v19  ;;  %v349_v45 = vld [vmem:[#allocation10 + $0x100] sm:$0xff]  ;;  %v2343_v47 = vpack.c.bf16 %v340_v41, %v336_v40  ;;  %v2346_v48 = vpack.c.bf16 %v354_v38, %v350_v37  ;;  %1419 = vmatpush1.bf16.msra.mxu1 %v2337_v39  ;;  %v358_v49 = vld [vmem:[#allocation10 + $0x148] sm:$0xff]  ;;  %v2349_v50 = vpack.c.bf16 %v339_v43, %v335_v42  ;;  %v344_v51 = vld [vmem:[#allocation10 + $0xd8] sm:$0xff] }
  0x9a   : > { %v353_v46 = vld [vmem:[#allocation10 + $0x120] sm:$0xff]  ;;  %v348_v52 = vld [vmem:[#allocation10 + $0xf8] sm:$0xff]  ;;  %v362_v53 = vld [vmem:[#allocation10 + $0x168] sm:$0xff]  ;;  %s947_s9 = scvt.s32.f32 %s946_s14 }
  0x9b   : > { %1421 = vmatprep.subr.bf16.mxu1 %v2343_v47  ;;  %v2352_v54 = vpack.c.bf16 %v348_v52, %v344_v51  ;;  %v343_v55 = vld [vmem:[#allocation10 + $0xd0] sm:$0xff]  ;;  %v2355_v57 = vpack.c.bf16 %v353_v46, %v349_v45  ;;  %v352_v58 = vld [vmem:[#allocation10 + $0x118] sm:$0xff]  ;;  %v2358_v60 = vpack.c.bf16 %v362_v53, %v358_v49  ;;  %v357_v61 = vld [vmem:[#allocation10 + $0x140] sm:$0xff] }
  0x9c   : > { %1391 = vmatpush1.bf16.msra.mxu0 %v2328_v28  ;;  %v347_v56 = vld [vmem:[#allocation10 + $0xf0] sm:$0xff]  ;;  %v356_v59 = vld [vmem:[#allocation10 + $0x138] sm:$0xff]  ;;  %v361_v62 = vld [vmem:[#allocation10 + $0x160] sm:$0xff]  ;;  %s950_s29 = ssub.f32 1.0, %s947_s9 }
  0x9d   : > { %1393 = vmatprep.subr.bf16.mxu0 %v2332_v32  ;;  %1423 = vmatpush1.bf16.msra.mxu1 %v2349_v50  ;;  %v366_v63 = vld [vmem:[#allocation10 + $0x188] sm:$0xff]  ;;  %v2361_v0 = vpack.c.bf16 %v347_v56, %v343_v55  ;;  %v2364_v2 = vpack.c.bf16 %v356_v59, %v352_v58  ;;  %v351_v3 = vld [vmem:[#allocation10 + $0x110] sm:$0xff]  ;;  %v360_v6 = vld [vmem:[#allocation10 + $0x158] sm:$0xff]  ;;  %v2367_v8 = vpack.c.bf16 %v361_v62, %v357_v61 }
  0x9e   : > { %v370_v1 = vld [vmem:[#allocation10 + $0x1a8] sm:$0xff]  ;;  %1425 = vmatprep.subr.bf16.mxu1 %v2352_v54  ;;  %v355_v4 = vld [vmem:[#allocation10 + $0x130] sm:$0xff]  ;;  %v364_v7 = vld [vmem:[#allocation10 + $0x178] sm:$0xff] }
  0x9f   : > { %v2370_v12 = vpack.c.bf16 %v370_v1, %v366_v63  ;;  %v365_v13 = vld [vmem:[#allocation10 + $0x180] sm:$0xff]  ;;  %v374_v15 = vld [vmem:[#allocation10 + $0x1c8] sm:$0xff]  ;;  %v2373_v17 = vpack.c.bf16 %v355_v4, %v351_v3  ;;  %v2376_v20 = vpack.c.bf16 %v364_v7, %v360_v6  ;;  %v359_v21 = vld [vmem:[#allocation10 + $0x150] sm:$0xff] }
  0xa0   : > { %1395 = vmatpush1.bf16.msra.mxu0 %v2341_v44  ;;  %v369_v14 = vld [vmem:[#allocation10 + $0x1a0] sm:$0xff]  ;;  %v378_v18 = vld [vmem:[#allocation10 + $0x1e8] sm:$0xff]  ;;  %v363_v22 = vld [vmem:[#allocation10 + $0x170] sm:$0xff] }
  0xa1   : > { %1397 = vmatprep.subr.bf16.mxu0 %v2346_v48  ;;  %1427 = vmatpush1.bf16.msra.mxu1 %v2361_v0  ;;  %v368_v23 = vld [vmem:[#allocation10 + $0x198] sm:$0xff]  ;;  %v2379_v26 = vpack.c.bf16 %v369_v14, %v365_v13  ;;  %v2382_v29 = vpack.c.bf16 %v378_v18, %v374_v15  ;;  %v373_v30 = vld [vmem:[#allocation10 + $0x1c0] sm:$0xff]  ;;  %v2385_v33 = vpack.c.bf16 %v363_v22, %v359_v21  ;;  %v367_v36 = vld [vmem:[#allocation10 + $0x190] sm:$0xff] }
  0xa2   : > { %1429 = vmatprep.subr.bf16.mxu1 %v2364_v2  ;;  %v372_v25 = vld [vmem:[#allocation10 + $0x1b8] sm:$0xff]  ;;  %v377_v31 = vld [vmem:[#allocation10 + $0x1e0] sm:$0xff]  ;;  %v371_v37 = vld [vmem:[#allocation10 + $0x1b0] sm:$0xff] }
  0xa3   : > { %v2388_v34 = vpack.c.bf16 %v372_v25, %v368_v23  ;;  %v376_v38 = vld [vmem:[#allocation10 + $0x1d8] sm:$0xff]  ;;  %v2391_v41 = vpack.c.bf16 %v377_v31, %v373_v30  ;;  %v2395_v42 = vpack.c.bf16 %v371_v37, %v367_v36  ;;  %v375_v45 = vld [vmem:[#allocation10 + $0x1d0] sm:$0xff]  ;;  %v2401_v49 = vld [vmem:[#allocation2] sm:$0xff]  ;;  %v564_v37 = vstv %s563_s19 }
  0xa4   : > { %1399 = vmatpush1.bf16.msra.mxu0 %v2355_v57  ;;  %v380_v40 = vld [vmem:[#allocation10 + $0x1f8] sm:$0xff]  ;;  %v379_v46 = vld [vmem:[#allocation10 + $0x1f0] sm:$0xff]  ;;  %v386_v63 = vld [vmem:[%s2289_s11 + $0x18] sm:$0xff] }
  0xa5   : > { %1401 = vmatprep.subr.bf16.mxu0 %v2358_v60  ;;  %1431 = vmatpush1.bf16.msra.mxu1 %v2373_v17  ;;  %v2398_v43 = vpack.c.bf16 %v380_v40, %v376_v38  ;;  %v2404_v51 = vpack.c.bf16 %v379_v46, %v375_v45  ;;  %v383_v52 = vld [vmem:[%s2289_s11] sm:$0xff]  ;;  %v384_v53 = vld [vmem:[%s2289_s11 + $0x8] sm:$0xff]  ;;  %v385_v6 = vld [vmem:[%s2289_s11 + $0x10] sm:$0xff]  ;;  %v561_v45 = vstv %s560_s16  ;;  %s1140_s16 = scalar_select %p1139_p7, 1, 0 }
  0xa6   : > { %1433 = vmatprep.subr.bf16.mxu1 %v2376_v20  ;;  %v382_v25 = vld [vmem:[#allocation3] sm:$0xff] }
  0xa7   : > { %v569_v46 = vmul.f32 %v564_v37, %v382_v25  ;;  %s1141_s19 = scvt.s32.f32 %s1140_s16 }
  0xa8   : > { %1403 = vmatpush1.bf16.msra.mxu0 %v2367_v8 }
  0xa9   : > { %1405 = vmatprep.subr.bf16.mxu0 %v2370_v12  ;;  %1435 = vmatpush1.bf16.msra.mxu1 %v2385_v33  ;;  %s1144_s7 = ssub.f32 1.0, %s1141_s19 }
  0xaa   : > { %1437 = vmatprep.subr.bf16.mxu1 %v2388_v34 }
  0xac   : > { %1407 = vmatpush1.bf16.msra.mxu0 %v2379_v26 }
  0xad   : > { %1409 = vmatprep.subr.bf16.mxu0 %v2382_v29  ;;  %1439 = vmatpush1.bf16.msra.mxu1 %v2395_v42 }
  0xae   : > { %1441 = vmatprep.subr.bf16.mxu1 %v2398_v43 }
  0xb0   : > { %1411 = vmatpush1.bf16.msra.mxu0 %v2391_v41 }
  0xb1   : > { %1445 = vmatprep.subr.bf16.mxu0 %v2308_v5  ;;  %1443 = vmatpush1.bf16.msra.mxu1 %v2404_v51 }
  0xb2   : > { %1477 = vmatprep.subr.bf16.mxu1 %v2323_v24 }
  0xb3   : > { %452 = vmatmul.mubr.f32.vlgmr.msra.gmra.mrb[0].mxu0 %v2401_v49 }
  0xb4   : > { %1447 = vmatpush1.bf16.msra.mxu0 %v2312_v10  ;;  %644 = vmatprep.mubr.f32.mxu0 %v2048_v9 }
  0xb5   : > { %1449 = vmatprep.subr.bf16.mxu0 %v2314_v11  ;;  %523 = vmatmul.mubr.f32.vlgmr.msra.gmra.mrb[0].mxu1 %v2401_v49 }
  0xb6   : > { %1479 = vmatpush1.bf16.msra.mxu1 %v2325_v27  ;;  %715 = vmatprep.mubr.f32.mxu1 %v2048_v9 }
  0xb7   : > { %1481 = vmatprep.subr.bf16.mxu1 %v2335_v35 }
  0xb8   : > { %1451 = vmatpush1.bf16.msra.mxu0 %v2318_v16 }
  0xb9   : > { %1453 = vmatprep.subr.bf16.mxu0 %v2321_v19 }
  0xba   : > { %1483 = vmatpush1.bf16.msra.mxu1 %v2337_v39 }
  0xbb   : > { %1485 = vmatprep.subr.bf16.mxu1 %v2343_v47 }
  0xbc   : > { %1455 = vmatpush1.bf16.msra.mxu0 %v2328_v28 }
  0xbd   : > { %1457 = vmatprep.subr.bf16.mxu0 %v2332_v32 }
  0xbe   : > { %1487 = vmatpush1.bf16.msra.mxu1 %v2349_v50 }
  0xbf   : > { %1489 = vmatprep.subr.bf16.mxu1 %v2352_v54 }
  0xc0   : > { %1459 = vmatpush1.bf16.msra.mxu0 %v2341_v44 }
  0xc1   : > { %1461 = vmatprep.subr.bf16.mxu0 %v2346_v48 }
  0xc2   : > { %1491 = vmatpush1.bf16.msra.mxu1 %v2361_v0 }
  0xc3   : > { %1493 = vmatprep.subr.bf16.mxu1 %v2364_v2 }
  0xc4   : > { %1463 = vmatpush1.bf16.msra.mxu0 %v2355_v57 }
  0xc5   : > { %1465 = vmatprep.subr.bf16.mxu0 %v2358_v60 }
  0xc6   : > { %1495 = vmatpush1.bf16.msra.mxu1 %v2373_v17 }
  0xc7   : > { %1497 = vmatprep.subr.bf16.mxu1 %v2376_v20 }
  0xc8   : > { %1467 = vmatpush1.bf16.msra.mxu0 %v2367_v8 }
  0xc9   : > { %1469 = vmatprep.subr.bf16.mxu0 %v2370_v12 }
  0xca   : > { %1499 = vmatpush1.bf16.msra.mxu1 %v2385_v33 }
  0xcb   : > { %1501 = vmatprep.subr.bf16.mxu1 %v2388_v34 }
  0xcc   : > { %1471 = vmatpush1.bf16.msra.mxu0 %v2379_v26 }
  0xcd   : > { %1473 = vmatprep.subr.bf16.mxu0 %v2382_v29 }
  0xce   : > { %1503 = vmatpush1.bf16.msra.mxu1 %v2395_v42 }
  0xcf   : > { %1505 = vmatprep.subr.bf16.mxu1 %v2398_v43 }
  0xd0   : > { %1475 = vmatpush1.bf16.msra.mxu0 %v2391_v41 }
  0xd1   : > { %1509 = vmatprep.subr.bf16.mxu0 %v2308_v5 }
  0xd2   : > { %1507 = vmatpush1.bf16.msra.mxu1 %v2404_v51 }
  0xd3   : > { %1541 = vmatprep.subr.bf16.mxu1 %v2323_v24 }
 0x186   : > { %v453_v55 = vpop.f32.mrb[0].mxu0 }
 0x187   : > { %v529_v56 = vadd.f32 %v453_v55, %v383_v52  ;;  %v455_v58 = vpop.f32.mrb[1].mxu0 }
 0x188   : > { %v530_v59 = vadd.f32 %v455_v58, %v384_v53  ;;  %v524_v1 = vpop.f32.mrb[0].mxu1 }
 0x189   : > { %v1339_v61 = vmul.f32 -1.442695, %v529_v56  ;;  %v526_v3 = vpop.f32.mrb[1].mxu1  ;;  %v531_v13 = vadd.f32 %v524_v1, %v385_v6  ;;  %v1344_v1 = vld [vmem:[%s2289_s11 + $0x28] sm:$0xff] }
 0x18a   : > { %v1340_v62 = vmul.f32 -1.442695, %v530_v59  ;;  %v532_v4 = vadd.f32 %v526_v3, %v386_v63  ;;  %v565_v59 = vmul.f32 %v564_v37, %v2401_v49  ;;  %v1343_v49 = vld [vmem:[%s2289_s11 + $0x20] sm:$0xff] }
 0x18b   : > { %1732 = vpow2.f32 %v1339_v61 }
 0x18c   : > { %1734 = vpow2.f32 %v1340_v62  ;;  %v1341_v7 = vmul.f32 -1.442695, %v532_v4 }
 0x18e   : > { %1736 = vpow2.f32 %v1341_v7 }
 0x18f   : > { %1738 = vtanh.f32 %v531_v13 }
 0x195   : > { %v1733_v14 = vpop.eup %1732 }
 0x196   : > { %v1735_v15 = vpop.eup %1734  ;;  %v536_v18 = vadd.f32 1.0, %v1733_v14 }
 0x197   : > { %v542_v21 = vadd.f32 1.0, %v1735_v15 }
 0x198   : > { %1740 = vrcp.f32 %v536_v18  ;;  %v1737_v22 = vpop.eup %1736 }
 0x199   : > { %1742 = vrcp.f32 %v542_v21  ;;  %v1739_v23 = vpop.eup %1738  ;;  %v549_v31 = vadd.f32 1.0, %v1737_v22  ;;  %v1346_v21 = vld [vmem:[%s2289_s11 + $0x38] sm:$0xff] }
 0x19b   : > { %1744 = vrcp.f32 %v549_v31 }
 0x1a2   : > { %v1741_v30 = vpop.eup %1740 }
 0x1a3   : > { %v1743_v36 = vpop.eup %1742  ;;  %v553_v38 = vmul.f32 %v1741_v30, %v1739_v23  ;;  %v1345_v23 = vld [vmem:[%s2289_s11 + $0x30] sm:$0xff] }
 0x1a4   : > { %v552_v40 = vmul.f32 %v1743_v36, %v382_v25 }
 0x1a5   : > { %v1745_v56 = vpop.eup %1744 }
 0x1a6   : > { %v554_v52 = vadd.f32 %v553_v38, %v552_v40 }
 0x1a8   : > { %1746 = vtanh.f32 %v554_v52  ;;  %v568_v53 = vmul.f32 %v561_v45, %v554_v52 }
 0x1aa   : > { %v2454_v55 = vadd.f32 %v569_v46, %v568_v53 }
 0x1b2   : > { %v1747_v58 = vpop.eup %1746 }
 0x1b3   : > { %v556_v61 = vmul.f32 %v1747_v58, %v1745_v56  ;;  %v754_v56 = vstv %s753_s13  ;;  %v757_v58 = vstv %s756_s12 }
 0x1b5   : > { %v562_v62 = vmul.f32 %v561_v45, %v556_v61  ;;  %572 = vst [vmem:[%s2304_s17] sm:$0xff] %v556_v61  ;;  %v762_v61 = vmul.f32 %v757_v58, %v2454_v55 }
 0x1b7   : > { %v2458_v63 = vadd.f32 %v565_v59, %v562_v62 }
 0x1b9   : > { %645 = vmatmul.mubr.f32.vlgmr.msra.gmra.mrb[2].mxu0 %v2458_v63  ;;  %716 = vmatmul.mubr.f32.vlgmr.msra.gmra.mrb[2].mxu1 %v2458_v63 }
 0x1ba   : > { %1511 = vmatpush1.bf16.msra.mxu0 %v2312_v10  ;;  %1543 = vmatpush1.bf16.msra.mxu1 %v2325_v27 }
 0x1bb   : > { %1513 = vmatprep.subr.bf16.mxu0 %v2314_v11  ;;  %1545 = vmatprep.subr.bf16.mxu1 %v2335_v35 }
 0x1bc   : > { %838 = vmatprep.mubr.f32.mxu0 %v2048_v9  ;;  %909 = vmatprep.mubr.f32.mxu1 %v2048_v9 }
 0x1be   : > { %1515 = vmatpush1.bf16.msra.mxu0 %v2318_v16  ;;  %1547 = vmatpush1.bf16.msra.mxu1 %v2337_v39 }
 0x1bf   : > { %1517 = vmatprep.subr.bf16.mxu0 %v2321_v19  ;;  %1549 = vmatprep.subr.bf16.mxu1 %v2343_v47 }
 0x1c2   : > { %1519 = vmatpush1.bf16.msra.mxu0 %v2328_v28  ;;  %1551 = vmatpush1.bf16.msra.mxu1 %v2349_v50 }
 0x1c3   : > { %1521 = vmatprep.subr.bf16.mxu0 %v2332_v32  ;;  %1553 = vmatprep.subr.bf16.mxu1 %v2352_v54 }
 0x1c6   : > { %1523 = vmatpush1.bf16.msra.mxu0 %v2341_v44  ;;  %1555 = vmatpush1.bf16.msra.mxu1 %v2361_v0 }
 0x1c7   : > { %1525 = vmatprep.subr.bf16.mxu0 %v2346_v48  ;;  %1557 = vmatprep.subr.bf16.mxu1 %v2364_v2 }
 0x1ca   : > { %1527 = vmatpush1.bf16.msra.mxu0 %v2355_v57  ;;  %1559 = vmatpush1.bf16.msra.mxu1 %v2373_v17 }
 0x1cb   : > { %1529 = vmatprep.subr.bf16.mxu0 %v2358_v60  ;;  %1561 = vmatprep.subr.bf16.mxu1 %v2376_v20 }
 0x1ce   : > { %1531 = vmatpush1.bf16.msra.mxu0 %v2367_v8  ;;  %1563 = vmatpush1.bf16.msra.mxu1 %v2385_v33 }
 0x1cf   : > { %1533 = vmatprep.subr.bf16.mxu0 %v2370_v12  ;;  %1565 = vmatprep.subr.bf16.mxu1 %v2388_v34 }
 0x1d2   : > { %1535 = vmatpush1.bf16.msra.mxu0 %v2379_v26  ;;  %1567 = vmatpush1.bf16.msra.mxu1 %v2395_v42 }
 0x1d3   : > { %1537 = vmatprep.subr.bf16.mxu0 %v2382_v29  ;;  %1569 = vmatprep.subr.bf16.mxu1 %v2398_v43 }
 0x1d6   : > { %1539 = vmatpush1.bf16.msra.mxu0 %v2391_v41  ;;  %1571 = vmatpush1.bf16.msra.mxu1 %v2404_v51 }
 0x1d7   : > { %1573 = vmatprep.subr.bf16.mxu0 %v2308_v5  ;;  %1605 = vmatprep.subr.bf16.mxu1 %v2323_v24 }
 0x28c   : > { %v646_v3 = vpop.f32.mrb[2].mxu0  ;;  %v717_v4 = vpop.f32.mrb[2].mxu1 }
 0x28d   : > { %v722_v6 = vadd.f32 %v1343_v49, %v646_v3  ;;  %v648_v7 = vpop.f32.mrb[3].mxu0  ;;  %v719_v13 = vpop.f32.mrb[3].mxu1  ;;  %v724_v25 = vadd.f32 %v1345_v23, %v717_v4  ;;  %v1359_v23 = vld [vmem:[%s2289_s11 + $0x60] sm:$0xff] }
 0x28e   : > { %v723_v14 = vadd.f32 %v1344_v1, %v648_v7  ;;  %v725_v22 = vadd.f32 %v1346_v21, %v719_v13 }
 0x28f   : > { %v1347_v15 = vmul.f32 -1.442695, %v722_v6  ;;  %v758_v6 = vmul.f32 %v757_v58, %v2458_v63 }
 0x290   : > { %v1348_v18 = vmul.f32 -1.442695, %v723_v14  ;;  %v1349_v5 = vmul.f32 -1.442695, %v725_v22 }
 0x291   : > { %1748 = vpow2.f32 %v1347_v15 }
 0x292   : > { %1750 = vpow2.f32 %v1348_v18 }
 0x293   : > { %1752 = vpow2.f32 %v1349_v5  ;;  %v1360_v5 = vld [vmem:[%s2289_s11 + $0x68] sm:$0xff] }
 0x294   : > { %1754 = vtanh.f32 %v724_v25 }
 0x29b   : > { %v1749_v24 = vpop.eup %1748 }
 0x29c   : > { %v1751_v30 = vpop.eup %1750  ;;  %v729_v31 = vadd.f32 1.0, %v1749_v24 }
 0x29d   : > { %v735_v36 = vadd.f32 1.0, %v1751_v30  ;;  %v1753_v37 = vpop.eup %1752 }
 0x29e   : > { %1756 = vrcp.f32 %v729_v31  ;;  %v1755_v38 = vpop.eup %1754  ;;  %v742_v52 = vadd.f32 1.0, %v1753_v37 }
 0x29f   : > { %1758 = vrcp.f32 %v735_v36 }
 0x2a0   : > { %1760 = vrcp.f32 %v742_v52  ;;  %v1361_v52 = vld [vmem:[%s2289_s11 + $0x70] sm:$0xff] }
 0x2a8   : > { %v1757_v40 = vpop.eup %1756 }
 0x2a9   : > { %v1759_v45 = vpop.eup %1758  ;;  %v746_v46 = vmul.f32 %v1757_v40, %v1755_v38 }
 0x2aa   : > { %v745_v53 = vmul.f32 %v1759_v45, %v2454_v55  ;;  %v1761_v1 = vpop.eup %1760  ;;  %v1362_v45 = vld [vmem:[%s2289_s11 + $0x78] sm:$0xff] }
 0x2ac   : > { %v747_v59 = vadd.f32 %v746_v46, %v745_v53 }
 0x2ae   : > { %1762 = vtanh.f32 %v747_v59  ;;  %v761_v62 = vmul.f32 %v754_v56, %v747_v59 }
 0x2b0   : > { %v2503_v49 = vadd.f32 %v762_v61, %v761_v62 }
 0x2b8   : > { %v1763_v3 = vpop.eup %1762 }
 0x2b9   : > { %v749_v4 = vmul.f32 %v1763_v3, %v1761_v1 }
 0x2bb   : > { %v755_v7 = vmul.f32 %v754_v56, %v749_v4  ;;  %1350 = vst [vmem:[%s2304_s17 + $0x8] sm:$0xff] %v749_v4 }
 0x2bd   : > { %v2507_v13 = vadd.f32 %v758_v6, %v755_v7 }
 0x2bf   : > { %839 = vmatmul.mubr.f32.vlgmr.msra.gmra.mrb[4].mxu0 %v2507_v13  ;;  %910 = vmatmul.mubr.f32.vlgmr.msra.gmra.mrb[4].mxu1 %v2507_v13 }
 0x2c0   : > { %1575 = vmatpush1.bf16.msra.mxu0 %v2312_v10  ;;  %1607 = vmatpush1.bf16.msra.mxu1 %v2325_v27  ;;  %v1352_v10 = vld [vmem:[%s2289_s11 + $0x48] sm:$0xff] }
 0x2c1   : > { %1577 = vmatprep.subr.bf16.mxu0 %v2314_v11  ;;  %1609 = vmatprep.subr.bf16.mxu1 %v2335_v35 }
 0x2c2   : > { %1032 = vmatprep.mubr.f32.mxu0 %v2048_v9  ;;  %1103 = vmatprep.mubr.f32.mxu1 %v2048_v9  ;;  %v1351_v9 = vld [vmem:[%s2289_s11 + $0x40] sm:$0xff] }
 0x2c4   : > { %1579 = vmatpush1.bf16.msra.mxu0 %v2318_v16  ;;  %1611 = vmatpush1.bf16.msra.mxu1 %v2337_v39 }
 0x2c5   : > { %1581 = vmatprep.subr.bf16.mxu0 %v2321_v19  ;;  %1613 = vmatprep.subr.bf16.mxu1 %v2343_v47 }
 0x2c8   : > { %1583 = vmatpush1.bf16.msra.mxu0 %v2328_v28  ;;  %1615 = vmatpush1.bf16.msra.mxu1 %v2349_v50 }
 0x2c9   : > { %1585 = vmatprep.subr.bf16.mxu0 %v2332_v32  ;;  %1617 = vmatprep.subr.bf16.mxu1 %v2352_v54 }
 0x2cc   : > { %1587 = vmatpush1.bf16.msra.mxu0 %v2341_v44  ;;  %1619 = vmatpush1.bf16.msra.mxu1 %v2361_v0  ;;  %v1354_v44 = vld [vmem:[%s2289_s11 + $0x58] sm:$0xff] }
 0x2cd   : > { %1589 = vmatprep.subr.bf16.mxu0 %v2346_v48  ;;  %1621 = vmatprep.subr.bf16.mxu1 %v2364_v2  ;;  %v1353_v48 = vld [vmem:[%s2289_s11 + $0x50] sm:$0xff] }
 0x2d0   : > { %1591 = vmatpush1.bf16.msra.mxu0 %v2355_v57  ;;  %1623 = vmatpush1.bf16.msra.mxu1 %v2373_v17 }
 0x2d1   : > { %1593 = vmatprep.subr.bf16.mxu0 %v2358_v60  ;;  %1625 = vmatprep.subr.bf16.mxu1 %v2376_v20 }
 0x2d4   : > { %1595 = vmatpush1.bf16.msra.mxu0 %v2367_v8  ;;  %1627 = vmatpush1.bf16.msra.mxu1 %v2385_v33 }
 0x2d5   : > { %1597 = vmatprep.subr.bf16.mxu0 %v2370_v12  ;;  %1629 = vmatprep.subr.bf16.mxu1 %v2388_v34  ;;  %v948_v34 = vstv %s947_s9 }
 0x2d8   : > { %1599 = vmatpush1.bf16.msra.mxu0 %v2379_v26  ;;  %1631 = vmatpush1.bf16.msra.mxu1 %v2395_v42 }
 0x2d9   : > { %1601 = vmatprep.subr.bf16.mxu0 %v2382_v29  ;;  %1633 = vmatprep.subr.bf16.mxu1 %v2398_v43 }
 0x2dc   : > { %1603 = vmatpush1.bf16.msra.mxu0 %v2391_v41  ;;  %1635 = vmatpush1.bf16.msra.mxu1 %v2404_v51  ;;  %v951_v41 = vstv %s950_s29 }
 0x2dd   : > { %v956_v43 = vmul.f32 %v951_v41, %v2503_v49  ;;  %v952_v18 = vmul.f32 %v951_v41, %v2507_v13 }
 0x392   : > { %v840_v11 = vpop.f32.mrb[4].mxu0  ;;  %v911_v16 = vpop.f32.mrb[4].mxu1 }
 0x393   : > { %v916_v19 = vadd.f32 %v1351_v9, %v840_v11  ;;  %v842_v27 = vpop.f32.mrb[5].mxu0  ;;  %v913_v28 = vpop.f32.mrb[5].mxu1  ;;  %v918_v54 = vadd.f32 %v1353_v48, %v911_v16  ;;  %v1142_v9 = vstv %s1141_s19 }
 0x394   : > { %v917_v32 = vadd.f32 %v1352_v10, %v842_v27  ;;  %v919_v47 = vadd.f32 %v1354_v44, %v913_v28  ;;  %v1145_v10 = vstv %s1144_s7 }
 0x395   : > { %v1355_v35 = vmul.f32 -1.442695, %v916_v19 }
 0x396   : > { %v1356_v39 = vmul.f32 -1.442695, %v917_v32  ;;  %v1357_v50 = vmul.f32 -1.442695, %v919_v47 }
 0x397   : > { %1764 = vpow2.f32 %v1355_v35 }
 0x398   : > { %1766 = vpow2.f32 %v1356_v39 }
 0x399   : > { %1768 = vpow2.f32 %v1357_v50 }
 0x39a   : > { %1770 = vtanh.f32 %v918_v54 }
 0x3a1   : > { %v1765_v57 = vpop.eup %1764 }
 0x3a2   : > { %v1767_v60 = vpop.eup %1766  ;;  %v923_v0 = vadd.f32 1.0, %v1765_v57 }
 0x3a3   : > { %v929_v2 = vadd.f32 1.0, %v1767_v60  ;;  %v1769_v8 = vpop.eup %1768 }
 0x3a4   : > { %1772 = vrcp.f32 %v923_v0  ;;  %v1771_v12 = vpop.eup %1770  ;;  %v936_v29 = vadd.f32 1.0, %v1769_v8 }
 0x3a5   : > { %1774 = vrcp.f32 %v929_v2 }
 0x3a6   : > { %1776 = vrcp.f32 %v936_v29 }
 0x3ae   : > { %v1773_v17 = vpop.eup %1772 }
 0x3af   : > { %v1775_v20 = vpop.eup %1774  ;;  %v940_v26 = vmul.f32 %v1773_v17, %v1771_v12 }
 0x3b0   : > { %v939_v33 = vmul.f32 %v1775_v20, %v2503_v49  ;;  %v1777_v63 = vpop.eup %1776 }
 0x3b2   : > { %v941_v42 = vadd.f32 %v940_v26, %v939_v33 }
 0x3b4   : > { %1778 = vtanh.f32 %v941_v42  ;;  %v955_v51 = vmul.f32 %v948_v34, %v941_v42 }
 0x3b6   : > { %v957_v55 = vadd.f32 %v956_v43, %v955_v51 }
 0x3b8   : > { %v1150_v16 = vmul.f32 %v1145_v10, %v957_v55 }
 0x3be   : > { %v1779_v14 = vpop.eup %1778 }
 0x3bf   : > { %v943_v15 = vmul.f32 %v1779_v14, %v1777_v63 }
 0x3c1   : > { %v949_v21 = vmul.f32 %v948_v34, %v943_v15  ;;  %1358 = vst [vmem:[%s2304_s17 + $0x10] sm:$0xff] %v943_v15 }
 0x3c3   : > { %v953_v22 = vadd.f32 %v952_v18, %v949_v21 }
 0x3c5   : > { %1033 = vmatmul.mubr.f32.vlgmr.msra.gmra.mrb[6].mxu0 %v953_v22  ;;  %1104 = vmatmul.mubr.f32.vlgmr.msra.gmra.mrb[6].mxu1 %v953_v22  ;;  %v1146_v39 = vmul.f32 %v1145_v10, %v953_v22 }
 0x498   : > { %v1034_v25 = vpop.f32.mrb[6].mxu0  ;;  %v1105_v24 = vpop.f32.mrb[6].mxu1 }
 0x499   : > { %v1110_v30 = vadd.f32 %v1359_v23, %v1034_v25  ;;  %v1036_v31 = vpop.f32.mrb[7].mxu0  ;;  %v1107_v36 = vpop.f32.mrb[7].mxu1  ;;  %v1112_v56 = vadd.f32 %v1361_v52, %v1105_v24 }
 0x49a   : > { %v1111_v37 = vadd.f32 %v1360_v5, %v1036_v31  ;;  %v1113_v46 = vadd.f32 %v1362_v45, %v1107_v36 }
 0x49b   : > { %v1363_v38 = vmul.f32 -1.442695, %v1110_v30 }
 0x49c   : > { %v1364_v40 = vmul.f32 -1.442695, %v1111_v37  ;;  %v1365_v53 = vmul.f32 -1.442695, %v1113_v46 }
 0x49d   : > { %1780 = vpow2.f32 %v1363_v38 }
 0x49e   : > { %1782 = vpow2.f32 %v1364_v40 }
 0x49f   : > { %1784 = vpow2.f32 %v1365_v53 }
 0x4a0   : > { %1786 = vtanh.f32 %v1112_v56 }
 0x4a7   : > { %v1781_v58 = vpop.eup %1780 }
 0x4a8   : > { %v1783_v59 = vpop.eup %1782  ;;  %v1117_v61 = vadd.f32 1.0, %v1781_v58 }
 0x4a9   : > { %v1123_v62 = vadd.f32 1.0, %v1783_v59  ;;  %v1785_v49 = vpop.eup %1784 }
 0x4aa   : > { %1788 = vrcp.f32 %v1117_v61  ;;  %v1787_v1 = vpop.eup %1786  ;;  %v1130_v7 = vadd.f32 1.0, %v1785_v49 }
 0x4ab   : > { %1790 = vrcp.f32 %v1123_v62 }
 0x4ac   : > { %1792 = vrcp.f32 %v1130_v7 }
 0x4b4   : > { %v1789_v3 = vpop.eup %1788 }
 0x4b5   : > { %v1791_v4 = vpop.eup %1790  ;;  %v1134_v6 = vmul.f32 %v1789_v3, %v1787_v1 }
 0x4b6   : > { %v1133_v13 = vmul.f32 %v1791_v4, %v957_v55  ;;  %v1793_v28 = vpop.eup %1792 }
 0x4b8   : > { %v1135_v11 = vadd.f32 %v1134_v6, %v1133_v13 }
 0x4ba   : > { %1794 = vtanh.f32 %v1135_v11  ;;  %v1149_v19 = vmul.f32 %v1142_v9, %v1135_v11 }
 0x4bc   : > { %v1151_v27 = vadd.f32 %v1150_v16, %v1149_v19 }
 0x4be   : > { %1152 = vst [vmem:[#allocation3] sm:$0xff] %v1151_v27 }
 0x4c4   : > { %v1795_v32 = vpop.eup %1794 }
 0x4c5   : > { %v1137_v35 = vmul.f32 %v1795_v32, %v1793_v28  ;;  %1158 = sbr.rel (%p1367_p10) target bundleno = 1236 (0x4d4), region = 60  ;;  %v1161_v50 = vld [vmem:[#allocation3] sm:$0xff] (!%p1367_p10) }
 0x4c6   : > { %1162 = vst [vmem:[#allocation15] sm:$0xff] (!%p1367_p10), %v1161_v50 }
 0x4c7   : > { %v1143_v44 = vmul.f32 %v1142_v9, %v1137_v35  ;;  %1366 = vst [vmem:[%s2304_s17 + $0x18] sm:$0xff] %v1137_v35 }
 0x4c9   : > { %v1147_v47 = vadd.f32 %v1146_v39, %v1143_v44 }
 0x4cb   : > { %1148 = vst [vmem:[#allocation2] sm:$0xff] %v1147_v47 }
 0x4d2   : > { %v1159_v48 = vld [vmem:[#allocation2] sm:$0xff] }
 0x4d3   : > { %1160 = vst [vmem:[#allocation13] sm:$0xff] %v1159_v48 }
 0x4d4 PF: > { %s2049_s11 = smov [#allocation13]   ;;  %s1379_s26 = sshll.u32 %s2110_s25, 9 }
 0x4d5   : > { %s1191_s27 = sshll.u32 %s2049_s11, 4  ;;  %s2563_s15 = scalar_lea.hbm %s2653_s4, %s1379_s26  ;;  %s1192_s27 = int_to_ptr.vmem [resolvable:$true] %s1191_s27 }
 0x4d6   : > { %s1910_s14 = scalar_lea.vmem %s1192_s27, 128  ;;  %p2674_p0 = scmp.eq.s32.totalorder %s2110_s25, 2 }
 0x4d7   : > { %p1911_p13 = scmp.ne.s32.totalorder %s1192_s27, %s1910_s14  ;;  %p1917_p8 = scmp.lt.s32.totalorder %s1192_s27, %s1192_s27 }
 0x4d8   : > { %p1918_p12 = scmp.lt.s32.totalorder %s1910_s14, %s1910_s14 }
 0x4d9   : > { %p1912_p5 = pnand %p1911_p13, %p2674_p0 }
 0x4da   : > { %p1919_p2 = por %p1918_p12, %p1917_p8 }
 0x4db   : > { %p1913_p11 = pneg %p1912_p5 }
 0x4dd   : > { %p1920_p1 = pnand %p1919_p2, %p1913_p11 }
 0x4df   : > { %1923 = shalt.err (!%p1920_p1)
}
 0x4e0   : > { %s1924_s18 = scalar_lea.hbm %s2654_s5, 128  ;;  %p2675_p9 = pmov %p2674_p0 }
 0x4e1   : > { %p1925_p4 = scmp.ne.s32.totalorder %s2654_s5, %s1924_s18  ;;  %p1930_p10 = scmp.lt.u32.totalorder %s1924_s18, %s2654_s5 }
 0x4e3   : > { %p1926_p3 = pnand %p1925_p4, %p2675_p9 }
 0x4e5   : > { %p1927_p7 = pneg %p1926_p3 }
 0x4e7   : > { %p1932_p13 = pnand %p1930_p10, %p1927_p7 }
 0x4e9   : > { %1935 = shalt.err (!%p1932_p13)
}
 0x4ea   : > { %1652 = dma.vmem_to_hbm [thread:$0]  (%p2674_p0), %s1192_s27, 128, %s2654_s5, [#allocation14]  }
 0x4eb   : > { %s1177_s12 = sshll.u32 %s2304_s17, 4  ;;  %s1164_s14 = scalar_lea.sflag [#allocation6], %s2285_s30  ;;  %s2584_s12 = int_to_ptr.vmem [resolvable:$true] %s1177_s12 }
 0x4ec   : > { %s1936_s9 = scalar_lea.vmem %s2584_s12, 512  ;;  %s2050_s29 = smov [#allocation12]  }
 0x4ed   : > { %p1937_p5 = scmp.ne.s32.totalorder %s2584_s12, %s1936_s9  ;;  %s1940_s18 = sshll.u32 %s2050_s29, 4  ;;  %s1941_s18 = int_to_ptr.vmem [resolvable:$false] %s1940_s18 }
 0x4ee   : > { %s1942_s16 = scalar_lea.vmem %s1941_s18, 1024  ;;  %p1943_p12 = scmp.lt.s32.totalorder %s2584_s12, %s1941_s18 }
 0x4ef   : > { %p1938_p11 = pnand %p1937_p5, %p2234_p6  ;;  %p1944_p2 = scmp.lt.s32.totalorder %s1942_s16, %s1936_s9 }
 0x4f1   : > { %p1939_p8 = pneg %p1938_p11  ;;  %p1945_p1 = por %p1944_p2, %p1943_p12 }
 0x4f3   : > { %p1946_p4 = pnand %p1945_p1, %p1939_p8 }
 0x4f5   : > { %1949 = shalt.err (!%p1946_p4)
}
 0x4f6   : > { %s1950_s17 = scalar_lea.hbm %s2563_s15, 512  ;;  %s1954_s7 = scalar_lea.hbm %s2653_s4, 1536 }
 0x4f7   : > { %p1951_p9 = scmp.ne.s32.totalorder %s2563_s15, %s1950_s17  ;;  %p1955_p10 = scmp.lt.u32.totalorder %s2563_s15, %s2653_s4 }
 0x4f8   : > { %p1956_p13 = scmp.lt.u32.totalorder %s1954_s7, %s1950_s17  ;;  %p1958_p5 = scmp.lt.u32.totalorder %s1950_s17, %s2563_s15 }
 0x4f9   : > { %p1952_p3 = pnand %p1951_p9, %p2234_p6 }
 0x4fa   : > { %p1957_p0 = por %p1956_p13, %p1955_p10 }
 0x4fb   : > { %p1953_p7 = pneg %p1952_p3 }
 0x4fc   : > { %p1959_p11 = por %p1958_p5, %p1957_p0 }
 0x4fe   : > { %p1960_p8 = pnand %p1959_p11, %p1953_p7 }
 0x500   : > { %1963 = shalt.err (!%p1960_p8)
}
 0x501   : > { %s2051_s13 = smov 128   ;;  %s2052_s9 = smov 8  }
 0x502   : > { %1650 = dma.vmem_to_hbm [thread:$0]  (%p2234_p6), %s2584_s12, 512, %s2563_s15, %s1164_s14, %s2051_s13, %s2051_s13, %s2052_s9  }
 0x503   : > { %s2053_s29 = smov [#allocation15]   ;;  %p2676_p2 = scmp.eq.s32.totalorder %s2110_s25, 2 }
 0x504   : > { %s1202_s18 = sshll.u32 %s2053_s29, 4  ;;  %s1203_s18 = int_to_ptr.vmem [resolvable:$true] %s1202_s18 }
 0x505   : > { %s1964_s16 = scalar_lea.vmem %s1203_s18, 128  ;;  %p1971_p9 = scmp.lt.s32.totalorder %s1203_s18, %s1203_s18 }
 0x506   : > { %p1965_p12 = scmp.ne.s32.totalorder %s1203_s18, %s1964_s16  ;;  %p1972_p3 = scmp.lt.s32.totalorder %s1964_s16, %s1964_s16 }
 0x508   : > { %p1966_p1 = pnand %p1965_p12, %p2676_p2  ;;  %p1973_p7 = por %p1972_p3, %p1971_p9 }
 0x50a   : > { %p1967_p4 = pneg %p1966_p1 }
 0x50c   : > { %p1974_p10 = pnand %p1973_p7, %p1967_p4 }
 0x50e   : > { %1977 = shalt.err (!%p1974_p10)
}
 0x50f   : > { %s1978_s10 = scalar_lea.hbm %s2655_s6, 128  ;;  %p2677_p13 = pmov %p2676_p2 }
 0x510   : > { %p1979_p6 = scmp.ne.s32.totalorder %s2655_s6, %s1978_s10  ;;  %p1984_p11 = scmp.lt.u32.totalorder %s1978_s10, %s2655_s6 }
 0x512   : > { %p1980_p0 = pnand %p1979_p6, %p2677_p13 }
 0x514   : > { %p1981_p5 = pneg %p1980_p0 }
 0x516   : > { %p1986_p8 = pnand %p1984_p11, %p1981_p5 }
 0x518   : > { %1989 = shalt.err (!%p1986_p8)
}
 0x519   : > { %p2678_p12 = pmov %p2676_p2 }
 0x51b   : > { %1654 = dma.vmem_to_hbm [thread:$0]  (%p2678_p12), %s1203_s18, 128, %s2655_s6, [#allocation14]  }
 0x51c   : > { %2019 = dma.done.wait (%p2676_p2), [#allocation14], 256   ;;  %p2679_p1 = pmov %p2676_p2 }
 0x51e   : > { %2021 = vsyncadd (%p2679_p1), [#allocation14], 4294967040 }
 0x51f PF: > { %p1689_p4 = scmp.ge.s32.totalorder %s2040_s24, 2  ;;  %s1222_s11 = sand.u32 1, %s2028_s21  }
 0x520   : > { %p2680_p9 = scmp.ne.s32.totalorder %s2660_s28, 0  ;;  %s1223_s26 = scalar_lea.sflag [#allocation6], %s1222_s11 }
 0x522   : > { %p1675_p3 = pnand %p1689_p4, %p2680_p9 }
 0x524   : > { %2023 = dma.done.wait (!%p1675_p3), %s1223_s26, 512  }
 0x525   : > { %2025 = vsyncadd (!%p1675_p3), %s1223_s26, 4294966784  ;;  %p23_p7 = scmp.ge.s32.totalorder %s2220_s20, 5   ;;  %s2681_s21 = smov %s2032_s22 }
 0x526   : > { %s2682_s22 = smov %s2036_s23  ;;  %s2683_s23 = smov %s2230_s8 }
 0x527   : > { %s2684_s24 = smov %s2220_s20  ;;  %25 = sbr.rel (!%p23_p7) target bundleno = 8 (0x8), region = 123 }
 0x52e   :  { %1228 = vsyncpa [#allocation5], 1 }
 0x52f   :  { %1230 = vsyncpa [#allocation5 + $0x1], 1 }
 0x530   :  { %1231 = vsyncpa [#allocation8], 1 }
 0x531   :  { %1232 = vsyncpa [#allocation11], 1 }
 0x532   :  { %1233 = vsyncpa [#allocation6], 1 }
 0x533   :  { %1235 = vsyncpa [#allocation6 + $0x1], 1 }
 0x534   :  { %1236 = vsyncpa [#allocation14], 1 }

</bundles_post_ra>
